<compile_context>
chip_gen: v6e
topology: v6e:2x2x1
jax: 0.10.0
libtpu: 0.0.40
codegen_flags: <defaults>
</compile_context>

<pallas_src>
import functools

import jax
import jax.numpy as jnp
from jax.experimental import pallas as pl
from jax.experimental.pallas import tpu as pltpu


LN_EPS = 1e-5  # PyTorch nn.LayerNorm default


def _round_up(n, m):
    return ((n + m - 1) // m) * m


def resblock_kernel(x_ref, w1_ref, vec_ref, w2_ref, w3_ref, o_ref, *, c_true):
    cp = x_ref.shape[-1]
    x = x_ref[...].astype(jnp.float32)          # [tb, Cp] f32 (residual path)
    x_mx = x.astype(w1_ref.dtype)               # bf16 (or f32) for the MXU

    vec = vec_ref[...]                          # [8, Cp] packed vectors (f32)
    b1, g, beta, b2, b3 = vec[0:1], vec[1:2], vec[2:3], vec[3:4], vec[4:5]

    # --- fc[0]: Linear(in, out) --- (MXU, f32 accumulation)
    h = jnp.dot(x_mx, w1_ref[...], preferred_element_type=jnp.float32) + b1

    # --- fc[1]: LayerNorm(out) over the TRUE channel count ---
    # Padded lanes of h are exactly 0 (zero-padded weights/bias/inputs), so
    # the sum is correct; the variance masks padded lanes out explicitly.
    inv_c = jnp.float32(1.0 / c_true)
    mean = jnp.sum(h, axis=-1, keepdims=True) * inv_c
    cent = h - mean
    if c_true != cp:
        lane = jax.lax.broadcasted_iota(jnp.int32, (1, cp), 1)
        cent_v = jnp.where(lane < c_true, cent, 0.0)
    else:
        cent_v = cent
    var = jnp.sum(cent_v * cent_v, axis=-1, keepdims=True) * inv_c
    # gamma/beta are zero in padded lanes -> hn stays exactly 0 there.
    hn = cent * jax.lax.rsqrt(var + LN_EPS) * g + beta

    # --- fc[2]: Tanh --- (EUP)
    t = jnp.tanh(hn)

    # --- fc[3]: Linear(out, out); out = tanh(fc(x) + identity) ---
    fc_out = jnp.dot(t.astype(w2_ref.dtype), w2_ref[...],
                     preferred_element_type=jnp.float32) + b2
    out = jnp.tanh(fc_out + x)

    # --- fc1: Linear(out, out); out1 = tanh(fc1(out) + identity + out) ---
    out1 = jnp.dot(out.astype(w3_ref.dtype), w3_ref[...],
                   preferred_element_type=jnp.float32) + b3
    out1 = jnp.tanh(out1 + x + out)

    o_ref[...] = out1.astype(o_ref.dtype)


def _pick_tb(batch, cp, weight_bytes, budget_bytes=40 << 20):
    """Largest row-tile fitting a v7x-safe VMEM budget, with >=2 grid steps."""
    # per-row cost: in+out double-buffered (4*Cp*4B) + ~7 live f32 intermediates
    per_row = (4 + 7) * cp * 4
    avail = max(budget_bytes - weight_bytes, per_row * 8)
    tb_max = max(8, avail // per_row)
    # >=2 grid steps when possible so both v7x TensorCores are used.
    half = _round_up(max((batch + 1) // 2, 8), 8)
    tb = min(int(tb_max), 512, half, _round_up(batch, 8))
    return max(8, (tb // 8) * 8)


def resblock_pallas(x, params, *, tb=None, matmul_dtype=jnp.bfloat16):
    """Run the ResBlock forward pass. x: [B, C] float32, C == in == out."""
    x = jnp.asarray(x, jnp.float32)
    B, C = x.shape
    w1, b1, g, beta, w2, b2, w3, b3 = params

    # Lane-dense channel padding (multiple of 128). Zero padding keeps padded
    # lanes exactly 0 through the entire forward pass (see kernel comments).
    Cp = _round_up(C, 128)

    def pad_mat(w):
        return (jnp.zeros((Cp, Cp), jnp.float32).at[:C, :C].set(w)
                .astype(matmul_dtype))

    w1p, w2p, w3p = pad_mat(w1), pad_mat(w2), pad_mat(w3)

    # Pack the five per-channel vectors into one aligned (8, Cp) tile.
    vec = jnp.zeros((8, Cp), jnp.float32)
    vec = vec.at[0, :C].set(b1).at[1, :C].set(g).at[2, :C].set(beta)
    vec = vec.at[3, :C].set(b2).at[4, :C].set(b3)

    w_itemsize = jnp.dtype(matmul_dtype).itemsize
    weight_bytes = 3 * Cp * Cp * w_itemsize + 8 * Cp * 4
    if tb is None:
        tb = _pick_tb(B, Cp, weight_bytes)
    Bp = _round_up(B, tb)

    xp = x
    if Bp != B or Cp != C:
        xp = jnp.zeros((Bp, Cp), jnp.float32).at[:B, :C].set(x)

    grid = (Bp // tb,)
    kern = functools.partial(resblock_kernel, c_true=C)

    cost = pl.CostEstimate(
        flops=int(2 * 3 * Bp * Cp * Cp + 12 * Bp * Cp),
        transcendentals=int(3 * Bp * Cp + Bp),
        bytes_accessed=int(weight_bytes + 2 * Bp * Cp * 4),
    )

    def build(single_buffer_weights):
        pm = {}
        if single_buffer_weights:
            # Grid-invariant operands: one resident copy is enough.
            pm = dict(pipeline_mode=pl.Buffered(1))
        w_spec = pl.BlockSpec((Cp, Cp), lambda i: (0, 0), **pm)
        v_spec = pl.BlockSpec((8, Cp), lambda i: (0, 0), **pm)
        io_spec = pl.BlockSpec((tb, Cp), lambda i: (i, 0))
        return pl.pallas_call(
            kern,
            out_shape=jax.ShapeDtypeStruct((Bp, Cp), jnp.float32),
            grid_spec=pltpu.PrefetchScalarGridSpec(
                num_scalar_prefetch=0,
                grid=grid,
                in_specs=[io_spec, w_spec, v_spec, w_spec, w_spec],
                out_specs=io_spec,
            ),
            compiler_params=pltpu.CompilerParams(
                dimension_semantics=("parallel",),
                vmem_limit_bytes=48 * 1024 * 1024,  # < v7x's 64 MiB physical
            ),
            cost_estimate=cost,
        )

    try:
        out = build(True)(xp, w1p, vec, w2p, w3p)
    except Exception:
        # Fallback if single-buffering via pl.Buffered(1) is rejected.
        out = build(False)(xp, w1p, vec, w2p, w3p)

    if Bp != B or Cp != C:
        out = out[:B, :C]
    return out


# ----------------------------- reference & init ------------------------------

def orthogonal(key, n, gain=1.0):
    """Deterministic orthogonal init (square), matching nn.init.orthogonal_."""
    a = jax.random.normal(key, (n, n), dtype=jnp.float32)
    q, r = jnp.linalg.qr(a)
    q = q * jnp.sign(jnp.diag(r))[None, :]
    return gain * q


def make_params(key, channels):
    k1, k2, k3 = jax.random.split(key, 3)
    # nn.Linear weight is (out, in); transpose to (in, out) for x @ W.
    w1 = orthogonal(k1, channels).T          # fc[0] Linear(in, out)
    b1 = jnp.zeros((channels,), jnp.float32)
    g = jnp.ones((channels,), jnp.float32)   # LayerNorm weight (default init)
    beta = jnp.zeros((channels,), jnp.float32)
    w2 = orthogonal(k2, channels).T          # fc[3] Linear(out, out)
    b2 = jnp.zeros((channels,), jnp.float32)
    w3 = orthogonal(k3, channels).T          # fc1  Linear(out, out)
    b3 = jnp.zeros((channels,), jnp.float32)
    return (w1, b1, g, beta, w2, b2, w3, b3)


def resblock_ref(x, params):
    """Pure-JAX f32 reference for correctness check."""
    w1, b1, g, beta, w2, b2, w3, b3 = params
    h = x @ w1 + b1
    mean = h.mean(-1, keepdims=True)
    var = ((h - mean) ** 2).mean(-1, keepdims=True)
    hn = (h - mean) / jnp.sqrt(var + LN_EPS) * g + beta
    t = jnp.tanh(hn)
    out = jnp.tanh(t @ w2 + b2 + x)
    out1 = jnp.tanh(out @ w3 + b3 + x + out)
    return out1


if __name__ == "__main__":
    key = jax.random.PRNGKey(0)

    # Case 1: small, non-lane-dense channels (exercises the padding path).
    B, C = 16, 32
    kx, kp, key = jax.random.split(key, 3)
    x = jax.random.normal(kx, (B, C), dtype=jnp.float32)
    params = make_params(kp, C)
    y_ref = resblock_ref(x, params)
    y = jax.block_until_ready(
        resblock_pallas(x, params, matmul_dtype=jnp.float32))
    assert jnp.allclose(y, y_ref, atol=1e-4, rtol=1e-4), "padded f32 mismatch"

    # Case 2: lane-dense channels, multi-step grid (C multiple of 128).
    B2, C2 = 64, 128
    kx2, kp2 = jax.random.split(key)
    x2 = jax.random.normal(kx2, (B2, C2), dtype=jnp.float32)
    params2 = make_params(kp2, C2)
    y2_ref = resblock_ref(x2, params2)

    # f32 matmul path: tight structural check.
    y2_f32 = jax.block_until_ready(
        resblock_pallas(x2, params2, matmul_dtype=jnp.float32))
    assert jnp.allclose(y2_f32, y2_ref, atol=1e-4, rtol=1e-4), "f32 mismatch"

    # bf16 matmul path (default): looser tolerance for bf16 MXU inputs.
    y2_bf16 = jax.block_until_ready(resblock_pallas(x2, params2))
    assert jnp.allclose(y2_bf16, y2_ref, atol=3e-2, rtol=3e-2), "bf16 mismatch"

    print("KERNEL_OK")
</pallas_src>

<mosaic_0001>
module attributes {stable_mosaic.version = 11 : i64} {
  func.func @resblock_kernel(%arg0: i32, %arg1: memref<8x128xf32, #tpu.memory_space<vmem>>, %arg2: memref<128x128xf32, #tpu.memory_space<vmem>>, %arg3: memref<8x128xf32, #tpu.memory_space<vmem>>, %arg4: memref<128x128xf32, #tpu.memory_space<vmem>>, %arg5: memref<128x128xf32, #tpu.memory_space<vmem>>, %arg6: memref<8x128xf32, #tpu.memory_space<vmem>>) attributes {dimension_semantics = [#tpu.dimension_semantics<parallel>], iteration_bounds = array<i64: 2>, scalar_prefetch = 0 : i64, scratch_operands = 0 : i64, tpu.core_type = #tpu.core_type<tc>, window_params = [{transform_indices = @transform_0, window_bounds = array<i64: 8, 128>}, {pipeline_mode = #tpu.pipeline_mode<synchronous>, transform_indices = @transform_1, window_bounds = array<i64: 128, 128>}, {pipeline_mode = #tpu.pipeline_mode<synchronous>, transform_indices = @transform_2, window_bounds = array<i64: 8, 128>}, {pipeline_mode = #tpu.pipeline_mode<synchronous>, transform_indices = @transform_3, window_bounds = array<i64: 128, 128>}, {pipeline_mode = #tpu.pipeline_mode<synchronous>, transform_indices = @transform_4, window_bounds = array<i64: 128, 128>}, {transform_indices = @transform_5, window_bounds = array<i64: 8, 128>}]} {
    %c0 = arith.constant 0 : index
    %c0_0 = arith.constant 0 : index
    %0 = vector.load %arg1[%c0, %c0_0] : memref<8x128xf32, #tpu.memory_space<vmem>>, vector<8x128xf32>
    %c0_1 = arith.constant 0 : index
    %c0_2 = arith.constant 0 : index
    %1 = vector.load %arg3[%c0_1, %c0_2] : memref<8x128xf32, #tpu.memory_space<vmem>>, vector<8x128xf32>
    %2 = vector.extract_strided_slice %1 {offsets = [0, 0], sizes = [1, 128], strides = [1, 1]} : vector<8x128xf32> to vector<1x128xf32>
    %3 = vector.extract_strided_slice %1 {offsets = [1, 0], sizes = [1, 128], strides = [1, 1]} : vector<8x128xf32> to vector<1x128xf32>
    %4 = vector.extract_strided_slice %1 {offsets = [2, 0], sizes = [1, 128], strides = [1, 1]} : vector<8x128xf32> to vector<1x128xf32>
    %5 = vector.extract_strided_slice %1 {offsets = [3, 0], sizes = [1, 128], strides = [1, 1]} : vector<8x128xf32> to vector<1x128xf32>
    %6 = vector.extract_strided_slice %1 {offsets = [4, 0], sizes = [1, 128], strides = [1, 1]} : vector<8x128xf32> to vector<1x128xf32>
    %c0_3 = arith.constant 0 : index
    %c0_4 = arith.constant 0 : index
    %7 = vector.load %arg2[%c0_3, %c0_4] : memref<128x128xf32, #tpu.memory_space<vmem>>, vector<128x128xf32>
    %cst = arith.constant dense<0.000000e+00> : vector<8x128xf32>
    %8 = tpu.matmul %0, %7, %cst {dimension_numbers = #tpu.dot_dimension_numbers<[1], [0], [0], [1], [0, 0, 1, 1], [], []>} : vector<8x128xf32>, vector<128x128xf32>, vector<8x128xf32> -> vector<8x128xf32>
    %9 = vector.broadcast %2 : vector<1x128xf32> to vector<8x128xf32>
    %10 = arith.addf %8, %9 : vector<8x128xf32>
    %cst_5 = arith.constant dense<0.000000e+00> : vector<8xf32>
    %11 = vector.multi_reduction <add>, %10, %cst_5 [1] : vector<8x128xf32> to vector<8xf32>
    %12 = vector.shape_cast %11 : vector<8xf32> to vector<8x1xf32>
    %cst_6 = arith.constant 3.125000e-02 : f32
    %13 = vector.broadcast %cst_6 : f32 to vector<8x1xf32>
    %14 = arith.mulf %12, %13 : vector<8x1xf32>
    %15 = vector.broadcast %14 : vector<8x1xf32> to vector<8x128xf32>
    %16 = arith.subf %10, %15 : vector<8x128xf32>
    %17 = tpu.iota {dimensions = array<i32: 1>} : vector<1x128xi32>
    %c32_i32 = arith.constant 32 : i32
    %18 = vector.broadcast %c32_i32 : i32 to vector<1x128xi32>
    %19 = arith.cmpi slt, %17, %18 : vector<1x128xi32>
    %cst_7 = arith.constant 0.000000e+00 : f32
    %20 = vector.shape_cast %19 : vector<1x128xi1> to vector<1x128xi1>
    %21 = vector.broadcast %20 : vector<1x128xi1> to vector<8x128xi1>
    %22 = vector.broadcast %cst_7 : f32 to vector<8x128xf32>
    %23 = arith.select %21, %16, %22 : vector<8x128xi1>, vector<8x128xf32>
    %24 = arith.mulf %23, %23 : vector<8x128xf32>
    %cst_8 = arith.constant dense<0.000000e+00> : vector<8xf32>
    %25 = vector.multi_reduction <add>, %24, %cst_8 [1] : vector<8x128xf32> to vector<8xf32>
    %26 = vector.shape_cast %25 : vector<8xf32> to vector<8x1xf32>
    %cst_9 = arith.constant 3.125000e-02 : f32
    %27 = vector.broadcast %cst_9 : f32 to vector<8x1xf32>
    %28 = arith.mulf %26, %27 : vector<8x1xf32>
    %cst_10 = arith.constant 9.99999974E-6 : f32
    %29 = vector.broadcast %cst_10 : f32 to vector<8x1xf32>
    %30 = arith.addf %28, %29 : vector<8x1xf32>
    %31 = math.rsqrt %30 : vector<8x1xf32>
    %32 = vector.broadcast %31 : vector<8x1xf32> to vector<8x128xf32>
    %33 = arith.mulf %16, %32 : vector<8x128xf32>
    %34 = vector.broadcast %3 : vector<1x128xf32> to vector<8x128xf32>
    %35 = arith.mulf %33, %34 : vector<8x128xf32>
    %36 = vector.broadcast %4 : vector<1x128xf32> to vector<8x128xf32>
    %37 = arith.addf %35, %36 : vector<8x128xf32>
    %38 = math.tanh %37 : vector<8x128xf32>
    %c0_11 = arith.constant 0 : index
    %c0_12 = arith.constant 0 : index
    %39 = vector.load %arg4[%c0_11, %c0_12] : memref<128x128xf32, #tpu.memory_space<vmem>>, vector<128x128xf32>
    %cst_13 = arith.constant dense<0.000000e+00> : vector<8x128xf32>
    %40 = tpu.matmul %38, %39, %cst_13 {dimension_numbers = #tpu.dot_dimension_numbers<[1], [0], [0], [1], [0, 0, 1, 1], [], []>} : vector<8x128xf32>, vector<128x128xf32>, vector<8x128xf32> -> vector<8x128xf32>
    %41 = vector.broadcast %5 : vector<1x128xf32> to vector<8x128xf32>
    %42 = arith.addf %40, %41 : vector<8x128xf32>
    %43 = arith.addf %42, %0 : vector<8x128xf32>
    %44 = math.tanh %43 : vector<8x128xf32>
    %c0_14 = arith.constant 0 : index
    %c0_15 = arith.constant 0 : index
    %45 = vector.load %arg5[%c0_14, %c0_15] : memref<128x128xf32, #tpu.memory_space<vmem>>, vector<128x128xf32>
    %cst_16 = arith.constant dense<0.000000e+00> : vector<8x128xf32>
    %46 = tpu.matmul %44, %45, %cst_16 {dimension_numbers = #tpu.dot_dimension_numbers<[1], [0], [0], [1], [0, 0, 1, 1], [], []>} : vector<8x128xf32>, vector<128x128xf32>, vector<8x128xf32> -> vector<8x128xf32>
    %47 = vector.broadcast %6 : vector<1x128xf32> to vector<8x128xf32>
    %48 = arith.addf %46, %47 : vector<8x128xf32>
    %49 = arith.addf %48, %0 : vector<8x128xf32>
    %50 = arith.addf %49, %44 : vector<8x128xf32>
    %51 = math.tanh %50 : vector<8x128xf32>
    %c0_17 = arith.constant 0 : index
    %c0_18 = arith.constant 0 : index
    %52 = vector.load %arg6[%c0_17, %c0_18] : memref<8x128xf32, #tpu.memory_space<vmem>>, vector<8x128xf32>
    tpu.vector_store %arg6[%c0_17, %c0_18], %51 {strides = array<i32>} : memref<8x128xf32, #tpu.memory_space<vmem>>, vector<8x128xf32>,
    return
  }
  func.func @transform_0(%arg0: i32) -> (i32, i32) {
    %c0_i32 = arith.constant 0 : i32
    %c0_i32_0 = arith.constant 0 : i32
    return %arg0, %c0_i32 : i32, i32
  }
  func.func @transform_1(%arg0: i32) -> (i32, i32) {
    %c0_i32 = arith.constant 0 : i32
    %c0_i32_0 = arith.constant 0 : i32
    %c0_i32_1 = arith.constant 0 : i32
    return %c0_i32, %c0_i32_0 : i32, i32
  }
  func.func @transform_2(%arg0: i32) -> (i32, i32) {
    %c0_i32 = arith.constant 0 : i32
    %c0_i32_0 = arith.constant 0 : i32
    %c0_i32_1 = arith.constant 0 : i32
    return %c0_i32, %c0_i32_0 : i32, i32
  }
  func.func @transform_3(%arg0: i32) -> (i32, i32) {
    %c0_i32 = arith.constant 0 : i32
    %c0_i32_0 = arith.constant 0 : i32
    %c0_i32_1 = arith.constant 0 : i32
    return %c0_i32, %c0_i32_0 : i32, i32
  }
  func.func @transform_4(%arg0: i32) -> (i32, i32) {
    %c0_i32 = arith.constant 0 : i32
    %c0_i32_0 = arith.constant 0 : i32
    %c0_i32_1 = arith.constant 0 : i32
    return %c0_i32, %c0_i32_0 : i32, i32
  }
  func.func @transform_5(%arg0: i32) -> (i32, i32) {
    %c0_i32 = arith.constant 0 : i32
    %c0_i32_0 = arith.constant 0 : i32
    return %arg0, %c0_i32 : i32, i32
  }
}

module attributes {stable_mosaic.version = 11 : i64} {
  func.func @resblock_kernel(%arg0: i32, %arg1: memref<8x128xf32, #tpu.memory_space<vmem>>, %arg2: memref<128x128xf32, #tpu.memory_space<vmem>>, %arg3: memref<8x128xf32, #tpu.memory_space<vmem>>, %arg4: memref<128x128xf32, #tpu.memory_space<vmem>>, %arg5: memref<128x128xf32, #tpu.memory_space<vmem>>, %arg6: memref<8x128xf32, #tpu.memory_space<vmem>>) attributes {dimension_semantics = [#tpu.dimension_semantics<parallel>], iteration_bounds = array<i64: 2>, scalar_prefetch = 0 : i64, scratch_operands = 0 : i64, tpu.core_type = #tpu.core_type<tc>, window_params = [{transform_indices = @transform_0, window_bounds = array<i64: 8, 128>}, {pipeline_mode = #tpu.pipeline_mode<synchronous>, transform_indices = @transform_1, window_bounds = array<i64: 128, 128>}, {pipeline_mode = #tpu.pipeline_mode<synchronous>, transform_indices = @transform_2, window_bounds = array<i64: 8, 128>}, {pipeline_mode = #tpu.pipeline_mode<synchronous>, transform_indices = @transform_3, window_bounds = array<i64: 128, 128>}, {pipeline_mode = #tpu.pipeline_mode<synchronous>, transform_indices = @transform_4, window_bounds = array<i64: 128, 128>}, {transform_indices = @transform_5, window_bounds = array<i64: 8, 128>}]} {
    %c0 = arith.constant 0 : index
    %c0_0 = arith.constant 0 : index
    %0 = vector.load %arg1[%c0, %c0_0] : memref<8x128xf32, #tpu.memory_space<vmem>>, vector<8x128xf32>
    %c0_1 = arith.constant 0 : index
    %c0_2 = arith.constant 0 : index
    %1 = vector.load %arg3[%c0_1, %c0_2] : memref<8x128xf32, #tpu.memory_space<vmem>>, vector<8x128xf32>
    %2 = vector.extract_strided_slice %1 {offsets = [0, 0], sizes = [1, 128], strides = [1, 1]} : vector<8x128xf32> to vector<1x128xf32>
    %3 = vector.extract_strided_slice %1 {offsets = [1, 0], sizes = [1, 128], strides = [1, 1]} : vector<8x128xf32> to vector<1x128xf32>
    %4 = vector.extract_strided_slice %1 {offsets = [2, 0], sizes = [1, 128], strides = [1, 1]} : vector<8x128xf32> to vector<1x128xf32>
    %5 = vector.extract_strided_slice %1 {offsets = [3, 0], sizes = [1, 128], strides = [1, 1]} : vector<8x128xf32> to vector<1x128xf32>
    %6 = vector.extract_strided_slice %1 {offsets = [4, 0], sizes = [1, 128], strides = [1, 1]} : vector<8x128xf32> to vector<1x128xf32>
    %c0_3 = arith.constant 0 : index
    %c0_4 = arith.constant 0 : index
    %7 = vector.load %arg2[%c0_3, %c0_4] : memref<128x128xf32, #tpu.memory_space<vmem>>, vector<128x128xf32>
    %cst = arith.constant dense<0.000000e+00> : vector<8x128xf32>
    %8 = tpu.matmul %0, %7, %cst {dimension_numbers = #tpu.dot_dimension_numbers<[1], [0], [0], [1], [0, 0, 1, 1], [], []>} : vector<8x128xf32>, vector<128x128xf32>, vector<8x128xf32> -> vector<8x128xf32>
    %9 = vector.broadcast %2 : vector<1x128xf32> to vector<8x128xf32>
    %10 = arith.addf %8, %9 : vector<8x128xf32>
    %cst_5 = arith.constant dense<0.000000e+00> : vector<8xf32>
    %11 = vector.multi_reduction <add>, %10, %cst_5 [1] : vector<8x128xf32> to vector<8xf32>
    %12 = vector.shape_cast %11 : vector<8xf32> to vector<8x1xf32>
    %cst_6 = arith.constant 3.125000e-02 : f32
    %13 = vector.broadcast %cst_6 : f32 to vector<8x1xf32>
    %14 = arith.mulf %12, %13 : vector<8x1xf32>
    %15 = vector.broadcast %14 : vector<8x1xf32> to vector<8x128xf32>
    %16 = arith.subf %10, %15 : vector<8x128xf32>
    %17 = tpu.iota {dimensions = array<i32: 1>} : vector<1x128xi32>
    %c32_i32 = arith.constant 32 : i32
    %18 = vector.broadcast %c32_i32 : i32 to vector<1x128xi32>
    %19 = arith.cmpi slt, %17, %18 : vector<1x128xi32>
    %cst_7 = arith.constant 0.000000e+00 : f32
    %20 = vector.shape_cast %19 : vector<1x128xi1> to vector<1x128xi1>
    %21 = vector.broadcast %20 : vector<1x128xi1> to vector<8x128xi1>
    %22 = vector.broadcast %cst_7 : f32 to vector<8x128xf32>
    %23 = arith.select %21, %16, %22 : vector<8x128xi1>, vector<8x128xf32>
    %24 = arith.mulf %23, %23 : vector<8x128xf32>
    %cst_8 = arith.constant dense<0.000000e+00> : vector<8xf32>
    %25 = vector.multi_reduction <add>, %24, %cst_8 [1] : vector<8x128xf32> to vector<8xf32>
    %26 = vector.shape_cast %25 : vector<8xf32> to vector<8x1xf32>
    %cst_9 = arith.constant 3.125000e-02 : f32
    %27 = vector.broadcast %cst_9 : f32 to vector<8x1xf32>
    %28 = arith.mulf %26, %27 : vector<8x1xf32>
    %cst_10 = arith.constant 9.99999974E-6 : f32
    %29 = vector.broadcast %cst_10 : f32 to vector<8x1xf32>
    %30 = arith.addf %28, %29 : vector<8x1xf32>
    %31 = math.rsqrt %30 : vector<8x1xf32>
    %32 = vector.broadcast %31 : vector<8x1xf32> to vector<8x128xf32>
    %33 = arith.mulf %16, %32 : vector<8x128xf32>
    %34 = vector.broadcast %3 : vector<1x128xf32> to vector<8x128xf32>
    %35 = arith.mulf %33, %34 : vector<8x128xf32>
    %36 = vector.broadcast %4 : vector<1x128xf32> to vector<8x128xf32>
    %37 = arith.addf %35, %36 : vector<8x128xf32>
    %38 = math.tanh %37 : vector<8x128xf32>
    %c0_11 = arith.constant 0 : index
    %c0_12 = arith.constant 0 : index
    %39 = vector.load %arg4[%c0_11, %c0_12] : memref<128x128xf32, #tpu.memory_space<vmem>>, vector<128x128xf32>
    %cst_13 = arith.constant dense<0.000000e+00> : vector<8x128xf32>
    %40 = tpu.matmul %38, %39, %cst_13 {dimension_numbers = #tpu.dot_dimension_numbers<[1], [0], [0], [1], [0, 0, 1, 1], [], []>} : vector<8x128xf32>, vector<128x128xf32>, vector<8x128xf32> -> vector<8x128xf32>
    %41 = vector.broadcast %5 : vector<1x128xf32> to vector<8x128xf32>
    %42 = arith.addf %40, %41 : vector<8x128xf32>
    %43 = arith.addf %42, %0 : vector<8x128xf32>
    %44 = math.tanh %43 : vector<8x128xf32>
    %c0_14 = arith.constant 0 : index
    %c0_15 = arith.constant 0 : index
    %45 = vector.load %arg5[%c0_14, %c0_15] : memref<128x128xf32, #tpu.memory_space<vmem>>, vector<128x128xf32>
    %cst_16 = arith.constant dense<0.000000e+00> : vector<8x128xf32>
    %46 = tpu.matmul %44, %45, %cst_16 {dimension_numbers = #tpu.dot_dimension_numbers<[1], [0], [0], [1], [0, 0, 1, 1], [], []>} : vector<8x128xf32>, vector<128x128xf32>, vector<8x128xf32> -> vector<8x128xf32>
    %47 = vector.broadcast %6 : vector<1x128xf32> to vector<8x128xf32>
    %48 = arith.addf %46, %47 : vector<8x128xf32>
    %49 = arith.addf %48, %0 : vector<8x128xf32>
    %50 = arith.addf %49, %44 : vector<8x128xf32>
    %51 = math.tanh %50 : vector<8x128xf32>
    %c0_17 = arith.constant 0 : index
    %c0_18 = arith.constant 0 : index
    %52 = vector.load %arg6[%c0_17, %c0_18] : memref<8x128xf32, #tpu.memory_space<vmem>>, vector<8x128xf32>
    tpu.vector_store %arg6[%c0_17, %c0_18], %51 {strides = array<i32>} : memref<8x128xf32, #tpu.memory_space<vmem>>, vector<8x128xf32>,
    return
  }
  func.func @transform_0(%arg0: i32) -> (i32, i32) {
    %c0_i32 = arith.constant 0 : i32
    %c0_i32_0 = arith.constant 0 : i32
    return %arg0, %c0_i32 : i32, i32
  }
  func.func @transform_1(%arg0: i32) -> (i32, i32) {
    %c0_i32 = arith.constant 0 : i32
    %c0_i32_0 = arith.constant 0 : i32
    %c0_i32_1 = arith.constant 0 : i32
    return %c0_i32, %c0_i32_0 : i32, i32
  }
  func.func @transform_2(%arg0: i32) -> (i32, i32) {
    %c0_i32 = arith.constant 0 : i32
    %c0_i32_0 = arith.constant 0 : i32
    %c0_i32_1 = arith.constant 0 : i32
    return %c0_i32, %c0_i32_0 : i32, i32
  }
  func.func @transform_3(%arg0: i32) -> (i32, i32) {
    %c0_i32 = arith.constant 0 : i32
    %c0_i32_0 = arith.constant 0 : i32
    %c0_i32_1 = arith.constant 0 : i32
    return %c0_i32, %c0_i32_0 : i32, i32
  }
  func.func @transform_4(%arg0: i32) -> (i32, i32) {
    %c0_i32 = arith.constant 0 : i32
    %c0_i32_0 = arith.constant 0 : i32
    %c0_i32_1 = arith.constant 0 : i32
    return %c0_i32, %c0_i32_0 : i32, i32
  }
  func.func @transform_5(%arg0: i32) -> (i32, i32) {
    %c0_i32 = arith.constant 0 : i32
    %c0_i32_0 = arith.constant 0 : i32
    return %arg0, %c0_i32 : i32, i32
  }
}

</mosaic_0001>

<bundles_post_ra>
// kernel: tpu_custom_call.1
= control target key start
LH: loop header
LB: loop body
LE: loop exit
PB: predicated region body
PF: predicated region fallthrough
CT: control target
= control target key end

     0   :  { %10 = vsyncpa [#allocation3], 0  ;;  %s1547_s0 = inlined_call_operand.hbm [shape: f32[16,128], index: 0, kind: input, shape index: {}]   ;;  %s1548_s1 = inlined_call_operand.hbm [shape: f32[128,128], index: 1, kind: input, shape index: {}]   ;;  %s1549_s2 = inlined_call_operand.hbm [shape: f32[8,128], index: 2, kind: input, shape index: {}]   ;;  %s1550_s3 = inlined_call_operand.hbm [shape: f32[128,128], index: 3, kind: input, shape index: {}]   ;;  %s1551_s4 = inlined_call_operand.hbm [shape: f32[128,128], index: 4, kind: input, shape index: {}]   ;;  %s1552_s5 = inlined_call_operand.hbm [shape: f32[16,128], index: 5, kind: output, shape index: {}]  }
   0x1   :  { %12 = vsyncpa [#allocation3 + $0x1], 0 }
   0x2   :  { %13 = vsyncpa [#allocation6], 0 }
   0x3   :  { %14 = vsyncpa [#allocation9], 0 }
   0x4   :  { %15 = vsyncpa [#allocation4], 0 }
   0x5   :  { %17 = vsyncpa [#allocation4 + $0x1], 0  ;;  %s1245_s18 = smov 0   ;;  %s1247_s19 = smov 0  }
   0x6   :  { %s1249_s20 = smov 0   ;;  %s1251_s21 = smov 0  }
   0x7 LB: > { %s1205_s22 = smov [#allocation5]   ;;  %s1266_s24 = sadd.s32 4294967295, %s1203_s21   ;;  %s1203_s21 = sphi %s1251_s21, %s1576_s21   ;;  %s1199_s20 = sphi %s1249_s20, %s1575_s20   ;;  %s1195_s19 = sphi %s1247_s19, %s1574_s19   ;;  %s1191_s18 = sphi %s1245_s18, %s1573_s18  }
   0x8   : > { %s176_s23 = sshll.u32 %s1205_s22, 4  ;;  %p725_p0 = scmp.ge.s32.totalorder %s1203_s21, 1  ;;  %s177_s23 = int_to_ptr.vmem [resolvable:$true] %s176_s23 }
   0x9   : > { %p1553_p1 = scmp.eq.s32.totalorder %s1266_s24, 0  ;;  %p164_p2 = scmp.lt.s32.totalorder %s1203_s21, 3 }
   0xa   : > { %s1206_s26 = smov [#allocation8]   ;;  %s1207_s29 = smov [#allocation7]  }
   0xb   : > { %p1271_p3 = pnand %p725_p0, %p164_p2  ;;  %s200_s27 = sshll.u32 %s1206_s26, 4  ;;  %s1284_s27 = int_to_ptr.vmem [resolvable:$true] %s200_s27 }
   0xc   : > { %s190_s30 = sshll.u32 %s1207_s29, 4  ;;  %s1010_s6 = scalar_lea.vmem %s177_s23, 2048  ;;  %s1286_s30 = int_to_ptr.vmem [resolvable:$true] %s190_s30 }
   0xd   : > { %s1557_s25 = scalar_select %p1271_p3, 1, 0 }
   0xe   : > { %p920_p5 = pneg %p1271_p3  ;;  %p1011_p8 = scmp.ne.s32.totalorder %s177_s23, %s1010_s6 }
   0xf   : > { %p1018_p11 = scmp.lt.s32.totalorder %s177_s23, %s177_s23  ;;  %p1019_p12 = scmp.lt.s32.totalorder %s1010_s6, %s1010_s6 }
  0x10   : > { %p1280_p6 = pnand %p920_p5, %p1553_p1 }
  0x11   : > { %p1020_p13 = por %p1019_p12, %p1018_p11 }
  0x12   : > { %p1001_p7 = pneg %p1280_p6 }
  0x14   : > { %p1013_p9 = pnand %p1011_p8, %p1001_p7 }
  0x16   : > { %p1014_p10 = pneg %p1013_p9 }
  0x18   : > { %p1021_p0 = pnand %p1020_p13, %p1014_p10 }
  0x1a   : > { %1024 = shalt.err (!%p1021_p0)
}
  0x1b   : > { %s1208_s7 = smov 128   ;;  %s1209_s8 = smov 8  }
  0x1c   : > { %923 = dma.hbm_to_vmem [thread:$0]  (!%p1280_p6), %s1548_s1, 2048, %s177_s23, [#allocation6], %s1208_s7, %s1208_s7, %s1209_s8  }
  0x1d   : > { %s1036_s11 = scalar_lea.vmem %s1284_s27, 2048  ;;  %p1044_p9 = scmp.lt.s32.totalorder %s1284_s27, %s1284_s27 }
  0x1e   : > { %p1037_p2 = scmp.ne.s32.totalorder %s1284_s27, %s1036_s11  ;;  %p1045_p10 = scmp.lt.s32.totalorder %s1036_s11, %s1036_s11 }
  0x20   : > { %p1039_p5 = pnand %p1037_p2, %p1001_p7  ;;  %p1046_p11 = por %p1045_p10, %p1044_p9 }
  0x22   : > { %p1040_p8 = pneg %p1039_p5 }
  0x24   : > { %p1047_p12 = pnand %p1046_p11, %p1040_p8 }
  0x26   : > { %1050 = shalt.err (!%p1047_p12)
}
  0x27   : > { %929 = dma.hbm_to_vmem [thread:$0]  (!%p1280_p6), %s1550_s3, 2048, %s1284_s27, [#allocation9], %s1208_s7, %s1208_s7, %s1209_s8  }
  0x28   : > { %s1062_s14 = scalar_lea.vmem %s1286_s30, 128  ;;  %p1070_p5 = scmp.lt.s32.totalorder %s1286_s30, %s1286_s30 }
  0x29   : > { %p1063_p13 = scmp.ne.s32.totalorder %s1286_s30, %s1062_s14  ;;  %p1071_p8 = scmp.lt.s32.totalorder %s1062_s14, %s1062_s14 }
  0x2b   : > { %p1065_p0 = pnand %p1063_p13, %p1001_p7  ;;  %p1072_p9 = por %p1071_p8, %p1070_p5 }
  0x2d   : > { %p1066_p2 = pneg %p1065_p0 }
  0x2f   : > { %p1073_p10 = pnand %p1072_p9, %p1066_p2 }
  0x31   : > { %1076 = shalt.err (!%p1073_p10)
}
  0x32   : > { %926 = dma.hbm_to_vmem [thread:$0]  (!%p1280_p6), %s1549_s2, 128, %s1286_s30, [#allocation6]  }
  0x33   : > { %s1210_s17 = smov [#allocation10]  }
  0x34   : > { %s213_s22 = sshll.u32 %s1210_s17, 4  ;;  %s214_s22 = int_to_ptr.vmem [resolvable:$true] %s213_s22 }
  0x35   : > { %s1088_s23 = scalar_lea.vmem %s214_s22, 2048  ;;  %p1096_p0 = scmp.lt.s32.totalorder %s214_s22, %s214_s22 }
  0x36   : > { %p1089_p11 = scmp.ne.s32.totalorder %s214_s22, %s1088_s23  ;;  %p1097_p2 = scmp.lt.s32.totalorder %s1088_s23, %s1088_s23 }
  0x38   : > { %p1091_p12 = pnand %p1089_p11, %p1001_p7  ;;  %p1098_p5 = por %p1097_p2, %p1096_p0 }
  0x3a   : > { %p1092_p13 = pneg %p1091_p12 }
  0x3c   : > { %p1099_p8 = pnand %p1098_p5, %p1092_p13 }
  0x3e   : > { %1102 = shalt.err (!%p1099_p8)
}
  0x3f   : > { %932 = dma.hbm_to_vmem [thread:$0]  (!%p1280_p6), %s1551_s4, 2048, %s214_s22, [#allocation9], %s1208_s7, %s1208_s7, %s1209_s8  }
  0x40   : > { %s724_s28 = sadd.s32 4294967294, %s1203_s21   ;;  %s1343_s29 = sadd.s32 1, %s1203_s21  }
  0x41   : > { %s27_s30 = ssub.s32 %s1203_s21, %s1343_s29  ;;  %s30_s6 = sadd.s32 1, %s1199_s20 }
  0x42   : > { %p28_p7 = scmp.eq.s32.totalorder %s27_s30, 0  ;;  %p37_p9 = scmp.ne.s32.totalorder %s1199_s20, %s1195_s19 }
  0x43   : > { %p38_p10 = scmp.eq.s32.totalorder %s1203_s21, 0  ;;  %p43_p11 = scmp.ne.s32.totalorder %s1195_s19, %s1191_s18 }
  0x44   : > { %s1354_s9 = scalar_select %p28_p7, %s1199_s20, %s30_s6  }
  0x45   : > { %p1356_p12 = por %p38_p10, %p37_p9  ;;  %p1362_p6 = por %p1553_p1, %p43_p11 }
  0x46   : > { %p151_p13 = scmp.eq.s32.totalorder %s1266_s24, 1  ;;  %p157_p0 = scmp.eq.s32.totalorder %s724_s28, 1 }
  0x47   : > { %s1560_s7 = scalar_select %p1362_p6, 1, 0 }
  0x48   : > { %p945_p2 = scmp.lt.s32.totalorder %s1203_s21, 2  ;;  %s227_s8 = sand.u32 1, %s1199_s20  }
  0x49   : > { %p1369_p5 = por %p151_p13, %p37_p9  ;;  %p1373_p8 = por %p157_p0, %p43_p11 }
  0x4a   : > { %s731_s13 = sshll.u32 %s227_s8, 3  ;;  %s732_s14 = sshll.u32 %s1203_s21, 7 }
  0x4b   : > { %s1561_s11 = scalar_select %p1369_p5, 1, 0 }
  0x4c   : > { %s1562_s12 = scalar_select %p1373_p8, 1, 0 }
  0x4d   : > { %s1381_s17 = scalar_lea.hbm %s1547_s0, %s732_s14  ;;  %s231_s22 = scalar_lea.vmem [#allocation2], %s731_s13 }
  0x4e   : > { %s238_s23 = sshll.u32 %s231_s22, 4  ;;  %p1385_p7 = pnand %p945_p2, %p1356_p12  ;;  %s239_s23 = int_to_ptr.vmem [resolvable:$true] %s238_s23 }
  0x4f   : > { %s228_s27 = scalar_lea.sflag [#allocation3], %s227_s8  ;;  %s1103_s28 = scalar_lea.hbm %s1381_s17, 128 }
  0x50   : > { %p1104_p9 = scmp.ne.s32.totalorder %s1381_s17, %s1103_s28  ;;  %p1105_p10 = pneg %p1385_p7 }
  0x51   : > { %s1108_s14 = scalar_lea.hbm %s1547_s0, 256  ;;  %p1109_p0 = scmp.lt.s32.totalorder %s1381_s17, %s1547_s0 }
  0x52   : > { %p1106_p11 = pnand %p1105_p10, %p1104_p9  ;;  %p1110_p12 = scmp.lt.s32.totalorder %s1108_s14, %s1103_s28 }
  0x54   : > { %p1107_p13 = pneg %p1106_p11  ;;  %p1111_p2 = por %p1110_p12, %p1109_p0 }
  0x56   : > { %p1112_p4 = pnand %p1111_p2, %p1107_p13 }
  0x58   : > { %1115 = shalt.err (!%p1112_p4)
}
  0x59   : > { %s1116_s10 = scalar_lea.vmem %s239_s23, 128  ;;  %s1211_s8 = smov [#allocation2]  }
  0x5a   : > { %p1117_p1 = scmp.ne.s32.totalorder %s239_s23, %s1116_s10  ;;  %s1121_s16 = sshll.u32 %s1211_s8, 4  ;;  %s1122_s16 = int_to_ptr.vmem [resolvable:$false] %s1121_s16 }
  0x5b   : > { %s1123_s22 = scalar_lea.vmem %s1122_s16, 256  ;;  %p1124_p9 = scmp.lt.s32.totalorder %s239_s23, %s1122_s16 }
  0x5c   : > { %p1119_p8 = pnand %p1117_p1, %p1105_p10  ;;  %p1125_p11 = scmp.lt.s32.totalorder %s1123_s22, %s1116_s10 }
  0x5e   : > { %p1120_p5 = pneg %p1119_p8  ;;  %p1126_p6 = por %p1125_p11, %p1124_p9 }
  0x60   : > { %p1127_p3 = pnand %p1126_p6, %p1120_p5 }
  0x62   : > { %1130 = shalt.err (!%p1127_p3)
}
  0x63   : > { %936 = dma.hbm_to_vmem [thread:$0]  (!%p1385_p7), %s1381_s17, 128, %s239_s23, %s228_s27  }
  0x64   : > { %p1564_p13 = scmp.ne.s32.totalorder %s1557_s25, 0 }
  0x65   : > { %s1406_s28 = sand.u32 (!%p1564_p13), 1, %s1195_s19   ;;  %p1565_p1 = scmp.ne.s32.totalorder (!%p1564_p13), %s1560_s7, 0 }
  0x66   : > { %247 = sbr.rel (%p1564_p13) target bundleno = 1101 (0x44d), region = 40  ;;  %s734_s30 = sshll.u32 (!%p1564_p13), %s1406_s28, 3 }
  0x67   : > { %s250_s6 = scalar_lea.sflag (!%p1564_p13), [#allocation3], %s1406_s28  ;;  %s1412_s14 = scalar_lea.vmem (!%p1564_p13), [#allocation2], %s734_s30 }
  0x6b   : > { %1174 = dma.done.wait (%p1565_p1), %s250_s6, 128  }
  0x6c   : > { %1176 = vsyncadd (%p1565_p1), %s250_s6, 4294967168  ;;  %p1566_p3 = scmp.eq.s32.totalorder %s1266_s24, 0 }
  0x6e   : > { %1178 = dma.done.wait (%p1566_p3), [#allocation6], 2176   ;;  %p1567_p4 = pmov %p1566_p3 }
  0x6f   : > { %p1568_p6 = pmov %p1566_p3 }
  0x70   : > { %1180 = vsyncadd (%p1567_p4), [#allocation6], 4294965120 }
  0x71   : > { %1182 = dma.done.wait (%p1568_p6), [#allocation9], 4096   ;;  %p1569_p5 = pmov %p1566_p3 }
  0x72   : > { %v1212_v0 = vmov 0.0   ;;  %vm1213_vm0 = vmmov 0   ;;  %v313_v1 = vld [vmem:[#allocation5 + $0x78] sm:$0xff]  ;;  %v312_v2 = vld [vmem:[#allocation5 + $0x70] sm:$0xff]  ;;  %v311_v3 = vld [vmem:[#allocation5 + $0x68] sm:$0xff]  ;;  %v314_v18 = vlaneseq  ;;  %s741_s25 = sshll.u32 %s1266_s24, 7 }
  0x73   : > { %1184 = vsyncadd (%p1569_p5), [#allocation9], 4294963200  ;;  %795 = vmatprep.subr.mxu0 %v1212_v0  ;;  %827 = vmatprep.mubr.msk.f32.mxu0 %vm1213_vm0, %v1212_v0  ;;  %v310_v4 = vld [vmem:[#allocation5 + $0x60] sm:$0xff]  ;;  %v309_v5 = vld [vmem:[#allocation5 + $0x58] sm:$0xff]  ;;  %s295_s7 = scalar_lea.vmem [#allocation11], %s734_s30  ;;  %s1510_s27 = scalar_lea.hbm %s1552_s5, %s741_s25 }
  0x74   : > { %830 = vmatprep.subr.mxu1 %v1212_v0  ;;  %862 = vmatprep.mubr.msk.f32.mxu1 %vm1213_vm0, %v1212_v0  ;;  %v308_v6 = vld [vmem:[#allocation5 + $0x50] sm:$0xff]  ;;  %v307_v7 = vld [vmem:[#allocation5 + $0x48] sm:$0xff]  ;;  %v306_v8 = vld [vmem:[#allocation5 + $0x40] sm:$0xff]  ;;  %v1454_v19 = vshrl.u32 %v314_v18, 7  ;;  %v393_v26 = vand.u32 127, %v314_v18  ;;  %s616_s17 = sshll.u32 %s295_s7, 4  ;;  %s617_s17 = int_to_ptr.vmem [resolvable:$true] %s616_s17 }
  0x75   : > { %796 = vmatpush3.msra.mxu0 %v313_v1  ;;  %v305_v9 = vld [vmem:[#allocation5 + $0x38] sm:$0xff]  ;;  %v304_v10 = vld [vmem:[#allocation5 + $0x30] sm:$0xff]  ;;  %v303_v11 = vld [vmem:[#allocation5 + $0x28] sm:$0xff]  ;;  %s603_s13 = scalar_lea.sflag [#allocation4], %s1406_s28  ;;  %s1131_s15 = scalar_lea.vmem %s617_s17, 128 }
  0x76   : > { %797 = vmatprep.subr.mxu0 %v1212_v0  ;;  %v302_v12 = vld [vmem:[#allocation5 + $0x20] sm:$0xff]  ;;  %v301_v13 = vld [vmem:[#allocation5 + $0x18] sm:$0xff]  ;;  %v300_v14 = vld [vmem:[#allocation5 + $0x10] sm:$0xff]  ;;  %v316_v20 = vsub.s32 0, %v1454_v19  ;;  %vm394_vm1 = vcmp.lt.s32.totalorder %v393_v26, 32  ;;  %v407_v57 = vsub.s32 1, %v1454_v19  ;;  %p1132_p8 = scmp.ne.s32.totalorder %s617_s17, %s1131_s15 }
  0x77   : > { %798 = vmatpush3.msra.mxu0 %v312_v2  ;;  %v299_v15 = vld [vmem:[#allocation5 + $0x8] sm:$0xff]  ;;  %v298_v16 = vld [vmem:[#allocation5] sm:$0xff]  ;;  %v1447_v17 = vld [vmem:[%s1412_s14] sm:$0xff]  ;;  %v412_v58 = vsub.s32 2, %v1454_v19  ;;  %p1570_p7 = scmp.ne.s32.totalorder %s1561_s11, 0  ;;  %s1214_s10 = smov [#allocation11]  }
  0x78   : > { %799 = vmatprep.subr.mxu0 %v1212_v0  ;;  %v1457_v21 = vld [vmem:[#allocation7] sm:$0xff]  ;;  %v430_v33 = vld [vmem:[#allocation8 + $0x70] sm:$0xff]  ;;  %v429_v34 = vld [vmem:[#allocation8 + $0x68] sm:$0xff]  ;;  %s1135_s8 = sshll.u32 %s1214_s10, 4  ;;  %s1136_s8 = int_to_ptr.vmem [resolvable:$false] %s1135_s8 }
  0x79   : > { %800 = vmatpush3.msra.mxu0 %v311_v3  ;;  %v317_v22 = vrot.slane %v1457_v21, %v316_v20  ;;  %v431_v32 = vld [vmem:[#allocation8 + $0x78] sm:$0xff]  ;;  %v428_v35 = vld [vmem:[#allocation8 + $0x60] sm:$0xff]  ;;  %v426_v37 = vld [vmem:[#allocation8 + $0x50] sm:$0xff]  ;;  %v408_v59 = vrot.slane %v1457_v21, %v407_v57  ;;  %v413_v61 = vrot.slane %v1457_v21, %v412_v58  ;;  %p1133_p10 = pnand %p1132_p8, %p1570_p7  ;;  %s1137_s24 = scalar_lea.vmem %s1136_s8, 256 }
  0x7a   : > { %801 = vmatprep.subr.mxu0 %v1212_v0  ;;  %831 = vmatpush3.msra.mxu1 %v431_v32  ;;  %v427_v36 = vld [vmem:[#allocation8 + $0x58] sm:$0xff]  ;;  %v425_v38 = vld [vmem:[#allocation8 + $0x48] sm:$0xff]  ;;  %v424_v39 = vld [vmem:[#allocation8 + $0x40] sm:$0xff]  ;;  %p1138_p12 = scmp.lt.s32.totalorder %s617_s17, %s1136_s8  ;;  %p1139_p2 = scmp.lt.s32.totalorder %s1137_s24, %s1131_s15 }
  0x7b   : > { %802 = vmatpush3.msra.mxu0 %v310_v4  ;;  %832 = vmatprep.subr.mxu1 %v1212_v0  ;;  %v423_v40 = vld [vmem:[#allocation8 + $0x38] sm:$0xff]  ;;  %v422_v41 = vld [vmem:[#allocation8 + $0x30] sm:$0xff]  ;;  %v421_v42 = vld [vmem:[#allocation8 + $0x28] sm:$0xff]  ;;  %p1134_p0 = pneg %p1133_p10 }
  0x7c   : > { %803 = vmatprep.subr.mxu0 %v1212_v0  ;;  %833 = vmatpush3.msra.mxu1 %v430_v33  ;;  %v420_v43 = vld [vmem:[#allocation8 + $0x20] sm:$0xff]  ;;  %v419_v44 = vld [vmem:[#allocation8 + $0x18] sm:$0xff]  ;;  %v418_v45 = vld [vmem:[#allocation8 + $0x10] sm:$0xff]  ;;  %p1140_p9 = por %p1139_p2, %p1138_p12 }
  0x7d   : > { %804 = vmatpush3.msra.mxu0 %v309_v5  ;;  %834 = vmatprep.subr.mxu1 %v1212_v0  ;;  %v417_v46 = vld [vmem:[#allocation8 + $0x8] sm:$0xff]  ;;  %v416_v47 = vld [vmem:[#allocation8] sm:$0xff]  ;;  %v523_v48 = vld [vmem:[#allocation10 + $0x78] sm:$0xff] }
  0x7e   : > { %805 = vmatprep.subr.mxu0 %v1212_v0  ;;  %835 = vmatpush3.msra.mxu1 %v429_v34  ;;  %v522_v49 = vld [vmem:[#allocation10 + $0x70] sm:$0xff]  ;;  %v521_v50 = vld [vmem:[#allocation10 + $0x68] sm:$0xff]  ;;  %v520_v51 = vld [vmem:[#allocation10 + $0x60] sm:$0xff]  ;;  %p1141_p11 = pnand %p1140_p9, %p1134_p0 }
  0x7f   : > { %806 = vmatpush3.msra.mxu0 %v308_v6  ;;  %836 = vmatprep.subr.mxu1 %v1212_v0  ;;  %v519_v52 = vld [vmem:[#allocation10 + $0x58] sm:$0xff]  ;;  %v518_v53 = vld [vmem:[#allocation10 + $0x50] sm:$0xff]  ;;  %v517_v3 = vld [vmem:[#allocation10 + $0x48] sm:$0xff] }
  0x80   : > { %807 = vmatprep.subr.mxu0 %v1212_v0  ;;  %837 = vmatpush3.msra.mxu1 %v428_v35  ;;  %v516_v4 = vld [vmem:[#allocation10 + $0x40] sm:$0xff]  ;;  %v515_v5 = vld [vmem:[#allocation10 + $0x38] sm:$0xff]  ;;  %v514_v6 = vld [vmem:[#allocation10 + $0x30] sm:$0xff] }
  0x81   : > { %808 = vmatpush3.msra.mxu0 %v307_v7  ;;  %838 = vmatprep.subr.mxu1 %v1212_v0  ;;  %v513_v7 = vld [vmem:[#allocation10 + $0x28] sm:$0xff] }
  0x82   : > { %809 = vmatprep.subr.mxu0 %v1212_v0  ;;  %839 = vmatpush3.msra.mxu1 %v427_v36 }
  0x83   : > { %810 = vmatpush3.msra.mxu0 %v306_v8  ;;  %840 = vmatprep.subr.mxu1 %v1212_v0  ;;  %v512_v8 = vld [vmem:[#allocation10 + $0x20] sm:$0xff] }
  0x84   : > { %811 = vmatprep.subr.mxu0 %v1212_v0  ;;  %841 = vmatpush3.msra.mxu1 %v426_v37 }
  0x85   : > { %812 = vmatpush3.msra.mxu0 %v305_v9  ;;  %842 = vmatprep.subr.mxu1 %v1212_v0  ;;  %v511_v9 = vld [vmem:[#allocation10 + $0x18] sm:$0xff] }
  0x86   : > { %813 = vmatprep.subr.mxu0 %v1212_v0  ;;  %843 = vmatpush3.msra.mxu1 %v425_v38 }
  0x87   : > { %814 = vmatpush3.msra.mxu0 %v304_v10  ;;  %844 = vmatprep.subr.mxu1 %v1212_v0  ;;  %v510_v10 = vld [vmem:[#allocation10 + $0x10] sm:$0xff] }
  0x88   : > { %815 = vmatprep.subr.mxu0 %v1212_v0  ;;  %845 = vmatpush3.msra.mxu1 %v424_v39 }
  0x89   : > { %816 = vmatpush3.msra.mxu0 %v303_v11  ;;  %846 = vmatprep.subr.mxu1 %v1212_v0  ;;  %v509_v11 = vld [vmem:[#allocation10 + $0x8] sm:$0xff] }
  0x8a   : > { %817 = vmatprep.subr.mxu0 %v1212_v0  ;;  %847 = vmatpush3.msra.mxu1 %v423_v40 }
  0x8b   : > { %818 = vmatpush3.msra.mxu0 %v302_v12  ;;  %848 = vmatprep.subr.mxu1 %v1212_v0  ;;  %v508_v12 = vld [vmem:[#allocation10] sm:$0xff] }
  0x8c   : > { %819 = vmatprep.subr.mxu0 %v1212_v0  ;;  %849 = vmatpush3.msra.mxu1 %v422_v41 }
  0x8d   : > { %820 = vmatpush3.msra.mxu0 %v301_v13  ;;  %850 = vmatprep.subr.mxu1 %v1212_v0  ;;  %v434_v13 = vsub.s32 3, %v1454_v19 }
  0x8e   : > { %821 = vmatprep.subr.mxu0 %v1212_v0  ;;  %851 = vmatpush3.msra.mxu1 %v421_v42 }
  0x8f   : > { %822 = vmatpush3.msra.mxu0 %v300_v14  ;;  %852 = vmatprep.subr.mxu1 %v1212_v0  ;;  %v435_v14 = vrot.slane %v1457_v21, %v434_v13 }
  0x90   : > { %823 = vmatprep.subr.mxu0 %v1212_v0  ;;  %853 = vmatpush3.msra.mxu1 %v420_v43 }
  0x91   : > { %824 = vmatpush3.msra.mxu0 %v299_v15  ;;  %854 = vmatprep.subr.mxu1 %v1212_v0 }
  0x92   : > { %825 = vmatprep.subr.mxu0 %v1212_v0  ;;  %855 = vmatpush3.msra.mxu1 %v419_v44 }
  0x93   : > { %826 = vmatpush3.msra.mxu0 %v298_v16  ;;  %856 = vmatprep.subr.mxu1 %v1212_v0 }
  0x94   : > { %828 = vmatmul.mubr.f32.vlgmr.msra.gmra.mxu0 %v1447_v17  ;;  %865 = vmatprep.subr.mxu0 %v1212_v0 }
  0x95   : > { %897 = vmatprep.mubr.msk.f32.mxu0 %vm1213_vm0, %v1212_v0  ;;  %857 = vmatpush3.msra.mxu1 %v418_v45 }
  0x96   : > { %858 = vmatprep.subr.mxu1 %v1212_v0  ;;  %866 = vmatpush3.msra.mxu0 %v523_v48 }
  0x97   : > { %859 = vmatpush3.msra.mxu1 %v417_v46  ;;  %867 = vmatprep.subr.mxu0 %v1212_v0 }
  0x98   : > { %860 = vmatprep.subr.mxu1 %v1212_v0  ;;  %868 = vmatpush3.msra.mxu0 %v522_v49 }
  0x99   : > { %861 = vmatpush3.msra.mxu1 %v416_v47  ;;  %869 = vmatprep.subr.mxu0 %v1212_v0 }
  0x9a   : > { %870 = vmatpush3.msra.mxu0 %v521_v50 }
  0x9b   : > { %871 = vmatprep.subr.mxu0 %v1212_v0 }
  0x9c   : > { %872 = vmatpush3.msra.mxu0 %v520_v51 }
  0x9d   : > { %873 = vmatprep.subr.mxu0 %v1212_v0 }
  0x9e   : > { %874 = vmatpush3.msra.mxu0 %v519_v52 }
  0x9f   : > { %875 = vmatprep.subr.mxu0 %v1212_v0 }
  0xa0   : > { %876 = vmatpush3.msra.mxu0 %v518_v53 }
  0xa1   : > { %877 = vmatprep.subr.mxu0 %v1212_v0 }
  0xa2   : > { %878 = vmatpush3.msra.mxu0 %v517_v3 }
  0xa3   : > { %879 = vmatprep.subr.mxu0 %v1212_v0 }
  0xa4   : > { %880 = vmatpush3.msra.mxu0 %v516_v4 }
  0xa5   : > { %881 = vmatprep.subr.mxu0 %v1212_v0 }
  0xa6   : > { %882 = vmatpush3.msra.mxu0 %v515_v5 }
  0xa7   : > { %883 = vmatprep.subr.mxu0 %v1212_v0 }
  0xa8   : > { %884 = vmatpush3.msra.mxu0 %v514_v6 }
  0xa9   : > { %885 = vmatprep.subr.mxu0 %v1212_v0 }
  0xaa   : > { %886 = vmatpush3.msra.mxu0 %v513_v7 }
  0xab   : > { %887 = vmatprep.subr.mxu0 %v1212_v0 }
  0xac   : > { %888 = vmatpush3.msra.mxu0 %v512_v8 }
  0xad   : > { %889 = vmatprep.subr.mxu0 %v1212_v0 }
  0xae   : > { %890 = vmatpush3.msra.mxu0 %v511_v9 }
  0xaf   : > { %891 = vmatprep.subr.mxu0 %v1212_v0 }
  0xb0   : > { %892 = vmatpush3.msra.mxu0 %v510_v10 }
  0xb1   : > { %893 = vmatprep.subr.mxu0 %v1212_v0 }
  0xb2   : > { %894 = vmatpush3.msra.mxu0 %v509_v11 }
  0xb3   : > { %895 = vmatprep.subr.mxu0 %v1212_v0 }
  0xb4   : > { %896 = vmatpush3.msra.mxu0 %v508_v12 }
 0x154   : > { %v384_v23 = vpop.f32.mrf.mxu0 }
 0x155   : > { %v385_v24 = vadd.f32 %v384_v23, %v317_v22  ;;  %v526_v23 = vsub.s32 4, %v1454_v19 }
 0x156   : > { %v829_v25 = vpop.f32.mrf.mxu0 }
 0x157   : > { %388 = vadd.xlane.f32.xlu0 %v385_v24  ;;  %v527_v0 = vrot.slane %v1457_v21, %v526_v23 }
 0x1e0   : > { %v389_v27 = vpop.xlane.xlu0 %388 }
 0x1e1   : > { %v390_v28 = vmul.f32 0.03125, %v389_v27 }
 0x1e3   : > { %v1460_v29 = vsub.f32 %v385_v24, %v390_v28 }
 0x1e5   : > { %v397_v30 = vsel %vm394_vm1, %v1460_v29, 0.0 }
 0x1e6   : > { %v398_v31 = vmul.f32 %v397_v30, %v397_v30 }
 0x1e8   : > { %399 = vadd.xlane.f32.xlu0 %v398_v31 }
 0x271   : > { %v400_v54 = vpop.xlane.xlu0 %399 }
 0x272   : > { %v401_v55 = vmul.f32 0.03125, %v400_v54 }
 0x274   : > { %v402_v56 = vadd.f32 1e-05, %v401_v55 }
 0x276   : > { %991 = vrsqrt.f32 %v402_v56 }
 0x283   : > { %v992_v60 = vpop.eup %991 }
 0x284   : > { %v404_v62 = vmul.f32 %v992_v60, %v1460_v29 }
 0x286   : > { %v409_v63 = vmul.f32 %v408_v59, %v404_v62 }
 0x288   : > { %v414_v1 = vadd.f32 %v413_v61, %v409_v63 }
 0x28a   : > { %993 = vtanh.f32 %v414_v1 }
 0x297   : > { %v994_v2 = vpop.eup %993 }
 0x298   : > { %863 = vmatmul.mubr.f32.vlgmr.msra.gmra.mxu1 %v994_v2 }
 0x358   : > { %v502_v15 = vpop.f32.mrf.mxu1 }
 0x359   : > { %v503_v16 = vadd.f32 %v502_v15, %v435_v14 }
 0x35a   : > { %v864_v18 = vpop.f32.mrf.mxu1 }
 0x35b   : > { %v506_v20 = vadd.f32 %v503_v16, %v1447_v17 }
 0x35d   : > { %995 = vtanh.f32 %v506_v20 }
 0x36a   : > { %v996_v22 = vpop.eup %995 }
 0x36b   : > { %898 = vmatmul.mubr.f32.vlgmr.msra.gmra.mxu0 %v996_v22 }
 0x42b   : > { %v594_v24 = vpop.f32.mrf.mxu0 }
 0x42c   : > { %v595_v25 = vadd.f32 %v594_v24, %v527_v0 }
 0x42d   : > { %v899_v26 = vpop.f32.mrf.mxu0 }
 0x42e   : > { %v598_v27 = vadd.f32 %v595_v25, %v1447_v17 }
 0x430   : > { %v599_v28 = vadd.f32 %v996_v22, %v598_v27 }
 0x432   : > { %997 = vtanh.f32 %v599_v28 }
 0x43f   : > { %v998_v19 = vpop.eup %997 }
 0x440   : > { %601 = vst [vmem:[%s295_s7] sm:$0xff] %v998_v19 }
 0x441   : > { %1144 = shalt.err (!%p1141_p11)
}
 0x442   : > { %s1145_s16 = scalar_lea.hbm %s1510_s27, 128  ;;  %s1149_s30 = scalar_lea.hbm %s1552_s5, 256 }
 0x443   : > { %p1146_p13 = scmp.ne.s32.totalorder %s1510_s27, %s1145_s16  ;;  %p1150_p4 = scmp.lt.s32.totalorder %s1510_s27, %s1552_s5 }
 0x444   : > { %p1151_p6 = scmp.lt.s32.totalorder %s1149_s30, %s1145_s16 }
 0x445   : > { %p1147_p1 = pnand %p1146_p13, %p1570_p7 }
 0x446   : > { %p1152_p5 = por %p1151_p6, %p1150_p4 }
 0x447   : > { %p1148_p3 = pneg %p1147_p1 }
 0x449   : > { %p1153_p8 = pnand %p1152_p5, %p1148_p3 }
 0x44b   : > { %1156 = shalt.err (!%p1153_p8)
}
 0x44c   : > { %918 = dma.vmem_to_hbm [thread:$0]  (%p1570_p7), %s617_s17, 128, %s1510_s27, %s603_s13  }
 0x44d PF: > { %s628_s25 = sand.u32 1, %s1191_s18   ;;  %p1571_p10 = scmp.ne.s32.totalorder %s1562_s12, 0 }
 0x44e   : > { %p1572_p0 = scmp.ge.s32.totalorder %s1203_s21, 2  ;;  %s629_s7 = scalar_lea.sflag [#allocation4], %s628_s25 }
 0x450   : > { %p938_p12 = pnand %p1572_p0, %p1571_p10 }
 0x452   : > { %p939_p2 = pneg %p938_p12 }
 0x454   : > { %1186 = dma.done.wait (%p939_p2), %s629_s7, 128  }
 0x455   : > { %1188 = vsyncadd (%p939_p2), %s629_s7, 4294967168  ;;  %p20_p9 = scmp.ge.s32.totalorder %s1343_s29, 4   ;;  %s1573_s18 = smov %s1195_s19 }
 0x456   : > { %s1574_s19 = smov %s1199_s20  ;;  %s1575_s20 = smov %s1354_s9 }
 0x457   : > { %s1576_s21 = smov %s1343_s29  ;;  %22 = sbr.rel (!%p20_p9) target bundleno = 7 (0x7), region = 101 }
 0x45c   :  { %634 = vsyncpa [#allocation3], 1 }
 0x45d   :  { %636 = vsyncpa [#allocation3 + $0x1], 1 }
 0x45e   :  { %637 = vsyncpa [#allocation6], 1 }
 0x45f   :  { %638 = vsyncpa [#allocation9], 1 }
 0x460   :  { %639 = vsyncpa [#allocation4], 1 }
 0x461   :  { %641 = vsyncpa [#allocation4 + $0x1], 1 }

// kernel: tpu_custom_call.1
= control target key start
LH: loop header
LB: loop body
LE: loop exit
PB: predicated region body
PF: predicated region fallthrough
CT: control target
= control target key end

     0   :  { %10 = vsyncpa [#allocation3], 0  ;;  %s1547_s0 = inlined_call_operand.hbm [shape: f32[16,128], index: 0, kind: input, shape index: {}]   ;;  %s1548_s1 = inlined_call_operand.hbm [shape: f32[128,128], index: 1, kind: input, shape index: {}]   ;;  %s1549_s2 = inlined_call_operand.hbm [shape: f32[8,128], index: 2, kind: input, shape index: {}]   ;;  %s1550_s3 = inlined_call_operand.hbm [shape: f32[128,128], index: 3, kind: input, shape index: {}]   ;;  %s1551_s4 = inlined_call_operand.hbm [shape: f32[128,128], index: 4, kind: input, shape index: {}]   ;;  %s1552_s5 = inlined_call_operand.hbm [shape: f32[16,128], index: 5, kind: output, shape index: {}]  }
   0x1   :  { %12 = vsyncpa [#allocation3 + $0x1], 0 }
   0x2   :  { %13 = vsyncpa [#allocation6], 0 }
   0x3   :  { %14 = vsyncpa [#allocation9], 0 }
   0x4   :  { %15 = vsyncpa [#allocation4], 0 }
   0x5   :  { %17 = vsyncpa [#allocation4 + $0x1], 0  ;;  %s1245_s18 = smov 0   ;;  %s1247_s19 = smov 0  }
   0x6   :  { %s1249_s20 = smov 0   ;;  %s1251_s21 = smov 0  }
   0x7 LB: > { %s1205_s22 = smov [#allocation5]   ;;  %s1266_s24 = sadd.s32 4294967295, %s1203_s21   ;;  %s1203_s21 = sphi %s1251_s21, %s1576_s21   ;;  %s1199_s20 = sphi %s1249_s20, %s1575_s20   ;;  %s1195_s19 = sphi %s1247_s19, %s1574_s19   ;;  %s1191_s18 = sphi %s1245_s18, %s1573_s18  }
   0x8   : > { %s176_s23 = sshll.u32 %s1205_s22, 4  ;;  %p725_p0 = scmp.ge.s32.totalorder %s1203_s21, 1  ;;  %s177_s23 = int_to_ptr.vmem [resolvable:$true] %s176_s23 }
   0x9   : > { %p1553_p1 = scmp.eq.s32.totalorder %s1266_s24, 0  ;;  %p164_p2 = scmp.lt.s32.totalorder %s1203_s21, 3 }
   0xa   : > { %s1206_s26 = smov [#allocation8]   ;;  %s1207_s29 = smov [#allocation7]  }
   0xb   : > { %p1271_p3 = pnand %p725_p0, %p164_p2  ;;  %s200_s27 = sshll.u32 %s1206_s26, 4  ;;  %s1284_s27 = int_to_ptr.vmem [resolvable:$true] %s200_s27 }
   0xc   : > { %s190_s30 = sshll.u32 %s1207_s29, 4  ;;  %s1010_s6 = scalar_lea.vmem %s177_s23, 2048  ;;  %s1286_s30 = int_to_ptr.vmem [resolvable:$true] %s190_s30 }
   0xd   : > { %s1557_s25 = scalar_select %p1271_p3, 1, 0 }
   0xe   : > { %p920_p5 = pneg %p1271_p3  ;;  %p1011_p8 = scmp.ne.s32.totalorder %s177_s23, %s1010_s6 }
   0xf   : > { %p1018_p11 = scmp.lt.s32.totalorder %s177_s23, %s177_s23  ;;  %p1019_p12 = scmp.lt.s32.totalorder %s1010_s6, %s1010_s6 }
  0x10   : > { %p1280_p6 = pnand %p920_p5, %p1553_p1 }
  0x11   : > { %p1020_p13 = por %p1019_p12, %p1018_p11 }
  0x12   : > { %p1001_p7 = pneg %p1280_p6 }
  0x14   : > { %p1013_p9 = pnand %p1011_p8, %p1001_p7 }
  0x16   : > { %p1014_p10 = pneg %p1013_p9 }
  0x18   : > { %p1021_p0 = pnand %p1020_p13, %p1014_p10 }
  0x1a   : > { %1024 = shalt.err (!%p1021_p0)
}
  0x1b   : > { %s1208_s7 = smov 128   ;;  %s1209_s8 = smov 8  }
  0x1c   : > { %923 = dma.hbm_to_vmem [thread:$0]  (!%p1280_p6), %s1548_s1, 2048, %s177_s23, [#allocation6], %s1208_s7, %s1208_s7, %s1209_s8  }
  0x1d   : > { %s1036_s11 = scalar_lea.vmem %s1284_s27, 2048  ;;  %p1044_p9 = scmp.lt.s32.totalorder %s1284_s27, %s1284_s27 }
  0x1e   : > { %p1037_p2 = scmp.ne.s32.totalorder %s1284_s27, %s1036_s11  ;;  %p1045_p10 = scmp.lt.s32.totalorder %s1036_s11, %s1036_s11 }
  0x20   : > { %p1039_p5 = pnand %p1037_p2, %p1001_p7  ;;  %p1046_p11 = por %p1045_p10, %p1044_p9 }
  0x22   : > { %p1040_p8 = pneg %p1039_p5 }
  0x24   : > { %p1047_p12 = pnand %p1046_p11, %p1040_p8 }
  0x26   : > { %1050 = shalt.err (!%p1047_p12)
}
  0x27   : > { %929 = dma.hbm_to_vmem [thread:$0]  (!%p1280_p6), %s1550_s3, 2048, %s1284_s27, [#allocation9], %s1208_s7, %s1208_s7, %s1209_s8  }
  0x28   : > { %s1062_s14 = scalar_lea.vmem %s1286_s30, 128  ;;  %p1070_p5 = scmp.lt.s32.totalorder %s1286_s30, %s1286_s30 }
  0x29   : > { %p1063_p13 = scmp.ne.s32.totalorder %s1286_s30, %s1062_s14  ;;  %p1071_p8 = scmp.lt.s32.totalorder %s1062_s14, %s1062_s14 }
  0x2b   : > { %p1065_p0 = pnand %p1063_p13, %p1001_p7  ;;  %p1072_p9 = por %p1071_p8, %p1070_p5 }
  0x2d   : > { %p1066_p2 = pneg %p1065_p0 }
  0x2f   : > { %p1073_p10 = pnand %p1072_p9, %p1066_p2 }
  0x31   : > { %1076 = shalt.err (!%p1073_p10)
}
  0x32   : > { %926 = dma.hbm_to_vmem [thread:$0]  (!%p1280_p6), %s1549_s2, 128, %s1286_s30, [#allocation6]  }
  0x33   : > { %s1210_s17 = smov [#allocation10]  }
  0x34   : > { %s213_s22 = sshll.u32 %s1210_s17, 4  ;;  %s214_s22 = int_to_ptr.vmem [resolvable:$true] %s213_s22 }
  0x35   : > { %s1088_s23 = scalar_lea.vmem %s214_s22, 2048  ;;  %p1096_p0 = scmp.lt.s32.totalorder %s214_s22, %s214_s22 }
  0x36   : > { %p1089_p11 = scmp.ne.s32.totalorder %s214_s22, %s1088_s23  ;;  %p1097_p2 = scmp.lt.s32.totalorder %s1088_s23, %s1088_s23 }
  0x38   : > { %p1091_p12 = pnand %p1089_p11, %p1001_p7  ;;  %p1098_p5 = por %p1097_p2, %p1096_p0 }
  0x3a   : > { %p1092_p13 = pneg %p1091_p12 }
  0x3c   : > { %p1099_p8 = pnand %p1098_p5, %p1092_p13 }
  0x3e   : > { %1102 = shalt.err (!%p1099_p8)
}
  0x3f   : > { %932 = dma.hbm_to_vmem [thread:$0]  (!%p1280_p6), %s1551_s4, 2048, %s214_s22, [#allocation9], %s1208_s7, %s1208_s7, %s1209_s8  }
  0x40   : > { %s724_s28 = sadd.s32 4294967294, %s1203_s21   ;;  %s1343_s29 = sadd.s32 1, %s1203_s21  }
  0x41   : > { %s27_s30 = ssub.s32 %s1203_s21, %s1343_s29  ;;  %s30_s6 = sadd.s32 1, %s1199_s20 }
  0x42   : > { %p28_p7 = scmp.eq.s32.totalorder %s27_s30, 0  ;;  %p37_p9 = scmp.ne.s32.totalorder %s1199_s20, %s1195_s19 }
  0x43   : > { %p38_p10 = scmp.eq.s32.totalorder %s1203_s21, 0  ;;  %p43_p11 = scmp.ne.s32.totalorder %s1195_s19, %s1191_s18 }
  0x44   : > { %s1354_s9 = scalar_select %p28_p7, %s1199_s20, %s30_s6  }
  0x45   : > { %p1356_p12 = por %p38_p10, %p37_p9  ;;  %p1362_p6 = por %p1553_p1, %p43_p11 }
  0x46   : > { %p151_p13 = scmp.eq.s32.totalorder %s1266_s24, 1  ;;  %p157_p0 = scmp.eq.s32.totalorder %s724_s28, 1 }
  0x47   : > { %s1560_s7 = scalar_select %p1362_p6, 1, 0 }
  0x48   : > { %p945_p2 = scmp.lt.s32.totalorder %s1203_s21, 2  ;;  %s227_s8 = sand.u32 1, %s1199_s20  }
  0x49   : > { %p1369_p5 = por %p151_p13, %p37_p9  ;;  %p1373_p8 = por %p157_p0, %p43_p11 }
  0x4a   : > { %s731_s13 = sshll.u32 %s227_s8, 3  ;;  %s732_s14 = sshll.u32 %s1203_s21, 7 }
  0x4b   : > { %s1561_s11 = scalar_select %p1369_p5, 1, 0 }
  0x4c   : > { %s1562_s12 = scalar_select %p1373_p8, 1, 0 }
  0x4d   : > { %s1381_s17 = scalar_lea.hbm %s1547_s0, %s732_s14  ;;  %s231_s22 = scalar_lea.vmem [#allocation2], %s731_s13 }
  0x4e   : > { %s238_s23 = sshll.u32 %s231_s22, 4  ;;  %p1385_p7 = pnand %p945_p2, %p1356_p12  ;;  %s239_s23 = int_to_ptr.vmem [resolvable:$true] %s238_s23 }
  0x4f   : > { %s228_s27 = scalar_lea.sflag [#allocation3], %s227_s8  ;;  %s1103_s28 = scalar_lea.hbm %s1381_s17, 128 }
  0x50   : > { %p1104_p9 = scmp.ne.s32.totalorder %s1381_s17, %s1103_s28  ;;  %p1105_p10 = pneg %p1385_p7 }
  0x51   : > { %s1108_s14 = scalar_lea.hbm %s1547_s0, 256  ;;  %p1109_p0 = scmp.lt.s32.totalorder %s1381_s17, %s1547_s0 }
  0x52   : > { %p1106_p11 = pnand %p1105_p10, %p1104_p9  ;;  %p1110_p12 = scmp.lt.s32.totalorder %s1108_s14, %s1103_s28 }
  0x54   : > { %p1107_p13 = pneg %p1106_p11  ;;  %p1111_p2 = por %p1110_p12, %p1109_p0 }
  0x56   : > { %p1112_p4 = pnand %p1111_p2, %p1107_p13 }
  0x58   : > { %1115 = shalt.err (!%p1112_p4)
}
  0x59   : > { %s1116_s10 = scalar_lea.vmem %s239_s23, 128  ;;  %s1211_s8 = smov [#allocation2]  }
  0x5a   : > { %p1117_p1 = scmp.ne.s32.totalorder %s239_s23, %s1116_s10  ;;  %s1121_s16 = sshll.u32 %s1211_s8, 4  ;;  %s1122_s16 = int_to_ptr.vmem [resolvable:$false] %s1121_s16 }
  0x5b   : > { %s1123_s22 = scalar_lea.vmem %s1122_s16, 256  ;;  %p1124_p9 = scmp.lt.s32.totalorder %s239_s23, %s1122_s16 }
  0x5c   : > { %p1119_p8 = pnand %p1117_p1, %p1105_p10  ;;  %p1125_p11 = scmp.lt.s32.totalorder %s1123_s22, %s1116_s10 }
  0x5e   : > { %p1120_p5 = pneg %p1119_p8  ;;  %p1126_p6 = por %p1125_p11, %p1124_p9 }
  0x60   : > { %p1127_p3 = pnand %p1126_p6, %p1120_p5 }
  0x62   : > { %1130 = shalt.err (!%p1127_p3)
}
  0x63   : > { %936 = dma.hbm_to_vmem [thread:$0]  (!%p1385_p7), %s1381_s17, 128, %s239_s23, %s228_s27  }
  0x64   : > { %p1564_p13 = scmp.ne.s32.totalorder %s1557_s25, 0 }
  0x65   : > { %s1406_s28 = sand.u32 (!%p1564_p13), 1, %s1195_s19   ;;  %p1565_p1 = scmp.ne.s32.totalorder (!%p1564_p13), %s1560_s7, 0 }
  0x66   : > { %247 = sbr.rel (%p1564_p13) target bundleno = 1101 (0x44d), region = 40  ;;  %s734_s30 = sshll.u32 (!%p1564_p13), %s1406_s28, 3 }
  0x67   : > { %s250_s6 = scalar_lea.sflag (!%p1564_p13), [#allocation3], %s1406_s28  ;;  %s1412_s14 = scalar_lea.vmem (!%p1564_p13), [#allocation2], %s734_s30 }
  0x6b   : > { %1174 = dma.done.wait (%p1565_p1), %s250_s6, 128  }
  0x6c   : > { %1176 = vsyncadd (%p1565_p1), %s250_s6, 4294967168  ;;  %p1566_p3 = scmp.eq.s32.totalorder %s1266_s24, 0 }
  0x6e   : > { %1178 = dma.done.wait (%p1566_p3), [#allocation6], 2176   ;;  %p1567_p4 = pmov %p1566_p3 }
  0x6f   : > { %p1568_p6 = pmov %p1566_p3 }
  0x70   : > { %1180 = vsyncadd (%p1567_p4), [#allocation6], 4294965120 }
  0x71   : > { %1182 = dma.done.wait (%p1568_p6), [#allocation9], 4096   ;;  %p1569_p5 = pmov %p1566_p3 }
  0x72   : > { %v1212_v0 = vmov 0.0   ;;  %vm1213_vm0 = vmmov 0   ;;  %v313_v1 = vld [vmem:[#allocation5 + $0x78] sm:$0xff]  ;;  %v312_v2 = vld [vmem:[#allocation5 + $0x70] sm:$0xff]  ;;  %v311_v3 = vld [vmem:[#allocation5 + $0x68] sm:$0xff]  ;;  %v314_v18 = vlaneseq  ;;  %s741_s25 = sshll.u32 %s1266_s24, 7 }
  0x73   : > { %1184 = vsyncadd (%p1569_p5), [#allocation9], 4294963200  ;;  %795 = vmatprep.subr.mxu0 %v1212_v0  ;;  %827 = vmatprep.mubr.msk.f32.mxu0 %vm1213_vm0, %v1212_v0  ;;  %v310_v4 = vld [vmem:[#allocation5 + $0x60] sm:$0xff]  ;;  %v309_v5 = vld [vmem:[#allocation5 + $0x58] sm:$0xff]  ;;  %s295_s7 = scalar_lea.vmem [#allocation11], %s734_s30  ;;  %s1510_s27 = scalar_lea.hbm %s1552_s5, %s741_s25 }
  0x74   : > { %830 = vmatprep.subr.mxu1 %v1212_v0  ;;  %862 = vmatprep.mubr.msk.f32.mxu1 %vm1213_vm0, %v1212_v0  ;;  %v308_v6 = vld [vmem:[#allocation5 + $0x50] sm:$0xff]  ;;  %v307_v7 = vld [vmem:[#allocation5 + $0x48] sm:$0xff]  ;;  %v306_v8 = vld [vmem:[#allocation5 + $0x40] sm:$0xff]  ;;  %v1454_v19 = vshrl.u32 %v314_v18, 7  ;;  %v393_v26 = vand.u32 127, %v314_v18  ;;  %s616_s17 = sshll.u32 %s295_s7, 4  ;;  %s617_s17 = int_to_ptr.vmem [resolvable:$true] %s616_s17 }
  0x75   : > { %796 = vmatpush3.msra.mxu0 %v313_v1  ;;  %v305_v9 = vld [vmem:[#allocation5 + $0x38] sm:$0xff]  ;;  %v304_v10 = vld [vmem:[#allocation5 + $0x30] sm:$0xff]  ;;  %v303_v11 = vld [vmem:[#allocation5 + $0x28] sm:$0xff]  ;;  %s603_s13 = scalar_lea.sflag [#allocation4], %s1406_s28  ;;  %s1131_s15 = scalar_lea.vmem %s617_s17, 128 }
  0x76   : > { %797 = vmatprep.subr.mxu0 %v1212_v0  ;;  %v302_v12 = vld [vmem:[#allocation5 + $0x20] sm:$0xff]  ;;  %v301_v13 = vld [vmem:[#allocation5 + $0x18] sm:$0xff]  ;;  %v300_v14 = vld [vmem:[#allocation5 + $0x10] sm:$0xff]  ;;  %v316_v20 = vsub.s32 0, %v1454_v19  ;;  %vm394_vm1 = vcmp.lt.s32.totalorder %v393_v26, 32  ;;  %v407_v57 = vsub.s32 1, %v1454_v19  ;;  %p1132_p8 = scmp.ne.s32.totalorder %s617_s17, %s1131_s15 }
  0x77   : > { %798 = vmatpush3.msra.mxu0 %v312_v2  ;;  %v299_v15 = vld [vmem:[#allocation5 + $0x8] sm:$0xff]  ;;  %v298_v16 = vld [vmem:[#allocation5] sm:$0xff]  ;;  %v1447_v17 = vld [vmem:[%s1412_s14] sm:$0xff]  ;;  %v412_v58 = vsub.s32 2, %v1454_v19  ;;  %p1570_p7 = scmp.ne.s32.totalorder %s1561_s11, 0  ;;  %s1214_s10 = smov [#allocation11]  }
  0x78   : > { %799 = vmatprep.subr.mxu0 %v1212_v0  ;;  %v1457_v21 = vld [vmem:[#allocation7] sm:$0xff]  ;;  %v430_v33 = vld [vmem:[#allocation8 + $0x70] sm:$0xff]  ;;  %v429_v34 = vld [vmem:[#allocation8 + $0x68] sm:$0xff]  ;;  %s1135_s8 = sshll.u32 %s1214_s10, 4  ;;  %s1136_s8 = int_to_ptr.vmem [resolvable:$false] %s1135_s8 }
  0x79   : > { %800 = vmatpush3.msra.mxu0 %v311_v3  ;;  %v317_v22 = vrot.slane %v1457_v21, %v316_v20  ;;  %v431_v32 = vld [vmem:[#allocation8 + $0x78] sm:$0xff]  ;;  %v428_v35 = vld [vmem:[#allocation8 + $0x60] sm:$0xff]  ;;  %v426_v37 = vld [vmem:[#allocation8 + $0x50] sm:$0xff]  ;;  %v408_v59 = vrot.slane %v1457_v21, %v407_v57  ;;  %v413_v61 = vrot.slane %v1457_v21, %v412_v58  ;;  %p1133_p10 = pnand %p1132_p8, %p1570_p7  ;;  %s1137_s24 = scalar_lea.vmem %s1136_s8, 256 }
  0x7a   : > { %801 = vmatprep.subr.mxu0 %v1212_v0  ;;  %831 = vmatpush3.msra.mxu1 %v431_v32  ;;  %v427_v36 = vld [vmem:[#allocation8 + $0x58] sm:$0xff]  ;;  %v425_v38 = vld [vmem:[#allocation8 + $0x48] sm:$0xff]  ;;  %v424_v39 = vld [vmem:[#allocation8 + $0x40] sm:$0xff]  ;;  %p1138_p12 = scmp.lt.s32.totalorder %s617_s17, %s1136_s8  ;;  %p1139_p2 = scmp.lt.s32.totalorder %s1137_s24, %s1131_s15 }
  0x7b   : > { %802 = vmatpush3.msra.mxu0 %v310_v4  ;;  %832 = vmatprep.subr.mxu1 %v1212_v0  ;;  %v423_v40 = vld [vmem:[#allocation8 + $0x38] sm:$0xff]  ;;  %v422_v41 = vld [vmem:[#allocation8 + $0x30] sm:$0xff]  ;;  %v421_v42 = vld [vmem:[#allocation8 + $0x28] sm:$0xff]  ;;  %p1134_p0 = pneg %p1133_p10 }
  0x7c   : > { %803 = vmatprep.subr.mxu0 %v1212_v0  ;;  %833 = vmatpush3.msra.mxu1 %v430_v33  ;;  %v420_v43 = vld [vmem:[#allocation8 + $0x20] sm:$0xff]  ;;  %v419_v44 = vld [vmem:[#allocation8 + $0x18] sm:$0xff]  ;;  %v418_v45 = vld [vmem:[#allocation8 + $0x10] sm:$0xff]  ;;  %p1140_p9 = por %p1139_p2, %p1138_p12 }
  0x7d   : > { %804 = vmatpush3.msra.mxu0 %v309_v5  ;;  %834 = vmatprep.subr.mxu1 %v1212_v0  ;;  %v417_v46 = vld [vmem:[#allocation8 + $0x8] sm:$0xff]  ;;  %v416_v47 = vld [vmem:[#allocation8] sm:$0xff]  ;;  %v523_v48 = vld [vmem:[#allocation10 + $0x78] sm:$0xff] }
  0x7e   : > { %805 = vmatprep.subr.mxu0 %v1212_v0  ;;  %835 = vmatpush3.msra.mxu1 %v429_v34  ;;  %v522_v49 = vld [vmem:[#allocation10 + $0x70] sm:$0xff]  ;;  %v521_v50 = vld [vmem:[#allocation10 + $0x68] sm:$0xff]  ;;  %v520_v51 = vld [vmem:[#allocation10 + $0x60] sm:$0xff]  ;;  %p1141_p11 = pnand %p1140_p9, %p1134_p0 }
  0x7f   : > { %806 = vmatpush3.msra.mxu0 %v308_v6  ;;  %836 = vmatprep.subr.mxu1 %v1212_v0  ;;  %v519_v52 = vld [vmem:[#allocation10 + $0x58] sm:$0xff]  ;;  %v518_v53 = vld [vmem:[#allocation10 + $0x50] sm:$0xff]  ;;  %v517_v3 = vld [vmem:[#allocation10 + $0x48] sm:$0xff] }
  0x80   : > { %807 = vmatprep.subr.mxu0 %v1212_v0  ;;  %837 = vmatpush3.msra.mxu1 %v428_v35  ;;  %v516_v4 = vld [vmem:[#allocation10 + $0x40] sm:$0xff]  ;;  %v515_v5 = vld [vmem:[#allocation10 + $0x38] sm:$0xff]  ;;  %v514_v6 = vld [vmem:[#allocation10 + $0x30] sm:$0xff] }
  0x81   : > { %808 = vmatpush3.msra.mxu0 %v307_v7  ;;  %838 = vmatprep.subr.mxu1 %v1212_v0  ;;  %v513_v7 = vld [vmem:[#allocation10 + $0x28] sm:$0xff] }
  0x82   : > { %809 = vmatprep.subr.mxu0 %v1212_v0  ;;  %839 = vmatpush3.msra.mxu1 %v427_v36 }
  0x83   : > { %810 = vmatpush3.msra.mxu0 %v306_v8  ;;  %840 = vmatprep.subr.mxu1 %v1212_v0  ;;  %v512_v8 = vld [vmem:[#allocation10 + $0x20] sm:$0xff] }
  0x84   : > { %811 = vmatprep.subr.mxu0 %v1212_v0  ;;  %841 = vmatpush3.msra.mxu1 %v426_v37 }
  0x85   : > { %812 = vmatpush3.msra.mxu0 %v305_v9  ;;  %842 = vmatprep.subr.mxu1 %v1212_v0  ;;  %v511_v9 = vld [vmem:[#allocation10 + $0x18] sm:$0xff] }
  0x86   : > { %813 = vmatprep.subr.mxu0 %v1212_v0  ;;  %843 = vmatpush3.msra.mxu1 %v425_v38 }
  0x87   : > { %814 = vmatpush3.msra.mxu0 %v304_v10  ;;  %844 = vmatprep.subr.mxu1 %v1212_v0  ;;  %v510_v10 = vld [vmem:[#allocation10 + $0x10] sm:$0xff] }
  0x88   : > { %815 = vmatprep.subr.mxu0 %v1212_v0  ;;  %845 = vmatpush3.msra.mxu1 %v424_v39 }
  0x89   : > { %816 = vmatpush3.msra.mxu0 %v303_v11  ;;  %846 = vmatprep.subr.mxu1 %v1212_v0  ;;  %v509_v11 = vld [vmem:[#allocation10 + $0x8] sm:$0xff] }
  0x8a   : > { %817 = vmatprep.subr.mxu0 %v1212_v0  ;;  %847 = vmatpush3.msra.mxu1 %v423_v40 }
  0x8b   : > { %818 = vmatpush3.msra.mxu0 %v302_v12  ;;  %848 = vmatprep.subr.mxu1 %v1212_v0  ;;  %v508_v12 = vld [vmem:[#allocation10] sm:$0xff] }
  0x8c   : > { %819 = vmatprep.subr.mxu0 %v1212_v0  ;;  %849 = vmatpush3.msra.mxu1 %v422_v41 }
  0x8d   : > { %820 = vmatpush3.msra.mxu0 %v301_v13  ;;  %850 = vmatprep.subr.mxu1 %v1212_v0  ;;  %v434_v13 = vsub.s32 3, %v1454_v19 }
  0x8e   : > { %821 = vmatprep.subr.mxu0 %v1212_v0  ;;  %851 = vmatpush3.msra.mxu1 %v421_v42 }
  0x8f   : > { %822 = vmatpush3.msra.mxu0 %v300_v14  ;;  %852 = vmatprep.subr.mxu1 %v1212_v0  ;;  %v435_v14 = vrot.slane %v1457_v21, %v434_v13 }
  0x90   : > { %823 = vmatprep.subr.mxu0 %v1212_v0  ;;  %853 = vmatpush3.msra.mxu1 %v420_v43 }
  0x91   : > { %824 = vmatpush3.msra.mxu0 %v299_v15  ;;  %854 = vmatprep.subr.mxu1 %v1212_v0 }
  0x92   : > { %825 = vmatprep.subr.mxu0 %v1212_v0  ;;  %855 = vmatpush3.msra.mxu1 %v419_v44 }
  0x93   : > { %826 = vmatpush3.msra.mxu0 %v298_v16  ;;  %856 = vmatprep.subr.mxu1 %v1212_v0 }
  0x94   : > { %828 = vmatmul.mubr.f32.vlgmr.msra.gmra.mxu0 %v1447_v17  ;;  %865 = vmatprep.subr.mxu0 %v1212_v0 }
  0x95   : > { %897 = vmatprep.mubr.msk.f32.mxu0 %vm1213_vm0, %v1212_v0  ;;  %857 = vmatpush3.msra.mxu1 %v418_v45 }
  0x96   : > { %858 = vmatprep.subr.mxu1 %v1212_v0  ;;  %866 = vmatpush3.msra.mxu0 %v523_v48 }
  0x97   : > { %859 = vmatpush3.msra.mxu1 %v417_v46  ;;  %867 = vmatprep.subr.mxu0 %v1212_v0 }
  0x98   : > { %860 = vmatprep.subr.mxu1 %v1212_v0  ;;  %868 = vmatpush3.msra.mxu0 %v522_v49 }
  0x99   : > { %861 = vmatpush3.msra.mxu1 %v416_v47  ;;  %869 = vmatprep.subr.mxu0 %v1212_v0 }
  0x9a   : > { %870 = vmatpush3.msra.mxu0 %v521_v50 }
  0x9b   : > { %871 = vmatprep.subr.mxu0 %v1212_v0 }
  0x9c   : > { %872 = vmatpush3.msra.mxu0 %v520_v51 }
  0x9d   : > { %873 = vmatprep.subr.mxu0 %v1212_v0 }
  0x9e   : > { %874 = vmatpush3.msra.mxu0 %v519_v52 }
  0x9f   : > { %875 = vmatprep.subr.mxu0 %v1212_v0 }
  0xa0   : > { %876 = vmatpush3.msra.mxu0 %v518_v53 }
  0xa1   : > { %877 = vmatprep.subr.mxu0 %v1212_v0 }
  0xa2   : > { %878 = vmatpush3.msra.mxu0 %v517_v3 }
  0xa3   : > { %879 = vmatprep.subr.mxu0 %v1212_v0 }
  0xa4   : > { %880 = vmatpush3.msra.mxu0 %v516_v4 }
  0xa5   : > { %881 = vmatprep.subr.mxu0 %v1212_v0 }
  0xa6   : > { %882 = vmatpush3.msra.mxu0 %v515_v5 }
  0xa7   : > { %883 = vmatprep.subr.mxu0 %v1212_v0 }
  0xa8   : > { %884 = vmatpush3.msra.mxu0 %v514_v6 }
  0xa9   : > { %885 = vmatprep.subr.mxu0 %v1212_v0 }
  0xaa   : > { %886 = vmatpush3.msra.mxu0 %v513_v7 }
  0xab   : > { %887 = vmatprep.subr.mxu0 %v1212_v0 }
  0xac   : > { %888 = vmatpush3.msra.mxu0 %v512_v8 }
  0xad   : > { %889 = vmatprep.subr.mxu0 %v1212_v0 }
  0xae   : > { %890 = vmatpush3.msra.mxu0 %v511_v9 }
  0xaf   : > { %891 = vmatprep.subr.mxu0 %v1212_v0 }
  0xb0   : > { %892 = vmatpush3.msra.mxu0 %v510_v10 }
  0xb1   : > { %893 = vmatprep.subr.mxu0 %v1212_v0 }
  0xb2   : > { %894 = vmatpush3.msra.mxu0 %v509_v11 }
  0xb3   : > { %895 = vmatprep.subr.mxu0 %v1212_v0 }
  0xb4   : > { %896 = vmatpush3.msra.mxu0 %v508_v12 }
 0x154   : > { %v384_v23 = vpop.f32.mrf.mxu0 }
 0x155   : > { %v385_v24 = vadd.f32 %v384_v23, %v317_v22  ;;  %v526_v23 = vsub.s32 4, %v1454_v19 }
 0x156   : > { %v829_v25 = vpop.f32.mrf.mxu0 }
 0x157   : > { %388 = vadd.xlane.f32.xlu0 %v385_v24  ;;  %v527_v0 = vrot.slane %v1457_v21, %v526_v23 }
 0x1e0   : > { %v389_v27 = vpop.xlane.xlu0 %388 }
 0x1e1   : > { %v390_v28 = vmul.f32 0.03125, %v389_v27 }
 0x1e3   : > { %v1460_v29 = vsub.f32 %v385_v24, %v390_v28 }
 0x1e5   : > { %v397_v30 = vsel %vm394_vm1, %v1460_v29, 0.0 }
 0x1e6   : > { %v398_v31 = vmul.f32 %v397_v30, %v397_v30 }
 0x1e8   : > { %399 = vadd.xlane.f32.xlu0 %v398_v31 }
 0x271   : > { %v400_v54 = vpop.xlane.xlu0 %399 }
 0x272   : > { %v401_v55 = vmul.f32 0.03125, %v400_v54 }
 0x274   : > { %v402_v56 = vadd.f32 1e-05, %v401_v55 }
 0x276   : > { %991 = vrsqrt.f32 %v402_v56 }
 0x283   : > { %v992_v60 = vpop.eup %991 }
 0x284   : > { %v404_v62 = vmul.f32 %v992_v60, %v1460_v29 }
 0x286   : > { %v409_v63 = vmul.f32 %v408_v59, %v404_v62 }
 0x288   : > { %v414_v1 = vadd.f32 %v413_v61, %v409_v63 }
 0x28a   : > { %993 = vtanh.f32 %v414_v1 }
 0x297   : > { %v994_v2 = vpop.eup %993 }
 0x298   : > { %863 = vmatmul.mubr.f32.vlgmr.msra.gmra.mxu1 %v994_v2 }
 0x358   : > { %v502_v15 = vpop.f32.mrf.mxu1 }
 0x359   : > { %v503_v16 = vadd.f32 %v502_v15, %v435_v14 }
 0x35a   : > { %v864_v18 = vpop.f32.mrf.mxu1 }
 0x35b   : > { %v506_v20 = vadd.f32 %v503_v16, %v1447_v17 }
 0x35d   : > { %995 = vtanh.f32 %v506_v20 }
 0x36a   : > { %v996_v22 = vpop.eup %995 }
 0x36b   : > { %898 = vmatmul.mubr.f32.vlgmr.msra.gmra.mxu0 %v996_v22 }
 0x42b   : > { %v594_v24 = vpop.f32.mrf.mxu0 }
 0x42c   : > { %v595_v25 = vadd.f32 %v594_v24, %v527_v0 }
 0x42d   : > { %v899_v26 = vpop.f32.mrf.mxu0 }
 0x42e   : > { %v598_v27 = vadd.f32 %v595_v25, %v1447_v17 }
 0x430   : > { %v599_v28 = vadd.f32 %v996_v22, %v598_v27 }
 0x432   : > { %997 = vtanh.f32 %v599_v28 }
 0x43f   : > { %v998_v19 = vpop.eup %997 }
 0x440   : > { %601 = vst [vmem:[%s295_s7] sm:$0xff] %v998_v19 }
 0x441   : > { %1144 = shalt.err (!%p1141_p11)
}
 0x442   : > { %s1145_s16 = scalar_lea.hbm %s1510_s27, 128  ;;  %s1149_s30 = scalar_lea.hbm %s1552_s5, 256 }
 0x443   : > { %p1146_p13 = scmp.ne.s32.totalorder %s1510_s27, %s1145_s16  ;;  %p1150_p4 = scmp.lt.s32.totalorder %s1510_s27, %s1552_s5 }
 0x444   : > { %p1151_p6 = scmp.lt.s32.totalorder %s1149_s30, %s1145_s16 }
 0x445   : > { %p1147_p1 = pnand %p1146_p13, %p1570_p7 }
 0x446   : > { %p1152_p5 = por %p1151_p6, %p1150_p4 }
 0x447   : > { %p1148_p3 = pneg %p1147_p1 }
 0x449   : > { %p1153_p8 = pnand %p1152_p5, %p1148_p3 }
 0x44b   : > { %1156 = shalt.err (!%p1153_p8)
}
 0x44c   : > { %918 = dma.vmem_to_hbm [thread:$0]  (%p1570_p7), %s617_s17, 128, %s1510_s27, %s603_s13  }
 0x44d PF: > { %s628_s25 = sand.u32 1, %s1191_s18   ;;  %p1571_p10 = scmp.ne.s32.totalorder %s1562_s12, 0 }
 0x44e   : > { %p1572_p0 = scmp.ge.s32.totalorder %s1203_s21, 2  ;;  %s629_s7 = scalar_lea.sflag [#allocation4], %s628_s25 }
 0x450   : > { %p938_p12 = pnand %p1572_p0, %p1571_p10 }
 0x452   : > { %p939_p2 = pneg %p938_p12 }
 0x454   : > { %1186 = dma.done.wait (%p939_p2), %s629_s7, 128  }
 0x455   : > { %1188 = vsyncadd (%p939_p2), %s629_s7, 4294967168  ;;  %p20_p9 = scmp.ge.s32.totalorder %s1343_s29, 4   ;;  %s1573_s18 = smov %s1195_s19 }
 0x456   : > { %s1574_s19 = smov %s1199_s20  ;;  %s1575_s20 = smov %s1354_s9 }
 0x457   : > { %s1576_s21 = smov %s1343_s29  ;;  %22 = sbr.rel (!%p20_p9) target bundleno = 7 (0x7), region = 101 }
 0x45c   :  { %634 = vsyncpa [#allocation3], 1 }
 0x45d   :  { %636 = vsyncpa [#allocation3 + $0x1], 1 }
 0x45e   :  { %637 = vsyncpa [#allocation6], 1 }
 0x45f   :  { %638 = vsyncpa [#allocation9], 1 }
 0x460   :  { %639 = vsyncpa [#allocation4], 1 }
 0x461   :  { %641 = vsyncpa [#allocation4 + $0x1], 1 }

</bundles_post_ra>
